<compile_context>
chip_gen: v7x
topology: tpu7x:2x2x1
jax: 0.10.0
libtpu: 0.0.40
codegen_flags: <defaults>
</compile_context>

<pallas_src>
import functools

import jax
import jax.numpy as jnp
from jax import lax
from jax.experimental import pallas as pl
from jax.experimental.pallas import tpu as pltpu


def _round_up(x, m):
    return ((x + m - 1) // m) * m


def _protodacl_kernel(inv_temp, n_pad, normalized,
                      fq_ref, fk_ref, labq_ref, labk_ref, pcnt_ref,
                      proto_ref, hp_ref,
                      out_ref, l_sc, pdot_sc, m_sc):
    qi = pl.program_id(0)
    ki = pl.program_id(1)
    nk = pl.num_programs(1)
    tq = fq_ref.shape[0]
    tk = fk_ref.shape[0]

    @pl.when(ki == 0)
    def _init():
        l_sc[...] = jnp.zeros_like(l_sc)
        pdot_sc[...] = jnp.zeros_like(pdot_sc)
        if not normalized:
            m_sc[...] = jnp.full(m_sc.shape, -jnp.inf, jnp.float32)

    fq = fq_ref[...]                       # (Tq, D) bf16, raw query features
    fk = fk_ref[...]                       # (Tk, D) bf16, keys pre-scaled by 1/T

    # logits tile on the MXU: bf16 operands, f32 accumulation.  Keys already
    # carry the 1/T factor, so `s` is the logits directly (no (T,T) scale pass).
    s = lax.dot_general(fq, fk, (((1,), (1,)), ((), ())),
                        preferred_element_type=jnp.float32)       # (Tq, Tk) f32

    lab_q = labq_ref[...]                  # (Tq, 1) int32  (padded rows = -2)
    lab_k = labk_ref[...]                  # (1, Tk) int32  (padded cols = -1)

    # Exact self-exclusion: global row index vs global col index.  Tiny iotas,
    # one (Tq,Tk) compare; no diagonal-tile capture, no cancellation at finalize.
    row_g = lax.broadcasted_iota(jnp.int32, (tq, 1), 0) + qi * tq
    col_g = lax.broadcasted_iota(jnp.int32, (1, tk), 1) + ki * tk
    not_self = row_g != col_g

    same_pos = (lab_q == lab_k) & not_self          # positives exclude self
    s_den = jnp.where(not_self, s, jnp.float32(-1e30))  # self dropped from denom

    if normalized:
        # Fast path: features L2-normalized -> logits <= 1/T, use static max.
        m_const = jnp.float32(inv_temp)
        l_sc[...] += jnp.sum(jnp.exp(s_den - m_const), axis=1, keepdims=True)
    else:
        # Fallback online-softmax max tracking for unnormalized inputs.
        m_prev = m_sc[...]
        m_new = jnp.maximum(m_prev, jnp.max(s_den, axis=1, keepdims=True))
        l_sc[...] = (jnp.exp(m_prev - m_new) * l_sc[...]
                     + jnp.sum(jnp.exp(s_den - m_new), axis=1, keepdims=True))
        m_sc[...] = m_new

    # positive-logit sum (count is precomputed in the wrapper).
    pdot_sc[...] += jnp.sum(jnp.where(same_pos, s, 0.0), axis=1, keepdims=True)

    @pl.when(ki == nk - 1)
    def _finalize():
        if normalized:
            m_f = jnp.float32(inv_temp)
            # padded key columns have exactly-zero features -> each contributed
            # exactly exp(0 - m) to every row's denominator; remove analytically.
            l_corr = l_sc[...] - jnp.float32(n_pad) * jnp.exp(jnp.float32(-inv_temp))
        else:
            m_f = m_sc[...]
            l_corr = l_sc[...] - jnp.float32(n_pad) * jnp.exp(-m_f)

        log_denom = m_f + jnp.log(l_corr + 1e-12)
        pcnt = pcnt_ref[...]                               # (Tq,1) positives per row
        # exact division (finalize runs once per q tile; no approx reciprocal).
        mlpp = (pdot_sc[...] - pcnt * log_denom) / (pcnt + 1e-12)

        # fused prototype-alignment terms (query features already resident).
        fq32 = fq.astype(jnp.float32)
        p32 = proto_ref[...].astype(jnp.float32)
        hp = hp_ref[...]                                   # (Tq,1) {0,1}
        dots = jnp.sum(fq32 * p32, axis=1, keepdims=True)
        dist = (1.0 - dots) * hp

        # single lane-dense output slab: lanes [0,64) = mlpp, [64,128) = dist.
        lane = lax.broadcasted_iota(jnp.int32, out_ref.shape, 1)
        out_ref[...] = jnp.where(lane < 64, mlpp, dist)


def protodacl_loss(features, prototypes, proto_exists, class_labels,
                   temperature=0.07, prototype_weight=0.5,
                   block_q=512, block_k=256, normalized=True):
    """features: (B, D) L2-normalized projections; prototypes: (C, D);
    proto_exists: (C,) bool; class_labels: (B,) int in [0, C).
    block_q / block_k: query / key tile sizes (use block_k=128 on v5e; pick
    block_q so the q-tile count is even on v7x to balance both TensorCores).
    normalized=False falls back to online-max softmax for unnormalized inputs."""
    B, D = features.shape
    C = prototypes.shape[0]
    inv_temp = float(1.0 / temperature)

    # rectangular tiles; make tk divide tq so one padded size serves both axes.
    tq = max(128, min(_round_up(block_q, 128), _round_up(B, 128)))
    tk = max(128, min(_round_up(block_k, 128), tq))
    tq = (tq // tk) * tk
    B_pad = _round_up(B, tq)
    pad = B_pad - B

    labels = class_labels.astype(jnp.int32)
    feats_q = features.astype(jnp.bfloat16)                      # raw queries
    feats_k = (features * inv_temp).astype(jnp.bfloat16)         # 1/T folded into keys
    proto_g = prototypes.astype(jnp.bfloat16)[labels]            # (B, D) per-sample prototype
    has_proto = proto_exists[labels].astype(jnp.float32)         # (B,)
    count = jnp.sum(has_proto)                                    # prototype count (wrapper-side)

    # per-row positive counts (same class, excluding self) — O(B + C) in the wrapper.
    hist = jnp.zeros((C,), jnp.float32).at[labels].add(1.0)
    pos_cnt = hist[labels] - 1.0

    if pad:
        feats_q = jnp.pad(feats_q, ((0, pad), (0, 0)))
        feats_k = jnp.pad(feats_k, ((0, pad), (0, 0)))            # pad keys are exactly zero
        proto_g = jnp.pad(proto_g, ((0, pad), (0, 0)))
        hp_v = jnp.pad(has_proto, (0, pad))
        pos_cnt = jnp.pad(pos_cnt, (0, pad))
        lab_q = jnp.pad(labels, (0, pad), constant_values=-2)     # pad rows match nothing
        lab_k = jnp.pad(labels, (0, pad), constant_values=-1)     # pad cols match nothing
    else:
        hp_v = has_proto
        lab_q = lab_k = labels

    labels_col = lab_q.reshape(B_pad, 1)
    labels_row = lab_k.reshape(1, B_pad)                          # lane-dense key labels
    hp_col = hp_v.reshape(B_pad, 1)
    pcnt_col = pos_cnt.reshape(B_pad, 1)

    kernel = functools.partial(_protodacl_kernel, inv_temp, int(pad), bool(normalized))

    grid = (B_pad // tq, B_pad // tk)
    grid_spec = pltpu.PrefetchScalarGridSpec(
        num_scalar_prefetch=0,
        grid=grid,
        in_specs=[
            pl.BlockSpec((tq, D), lambda qi, ki: (qi, 0)),        # query features
            pl.BlockSpec((tk, D), lambda qi, ki: (ki, 0)),        # key features (scaled)
            pl.BlockSpec((tq, 1), lambda qi, ki: (qi, 0)),        # query labels
            pl.BlockSpec((1, tk), lambda qi, ki: (0, ki)),        # key labels (lane-dense)
            pl.BlockSpec((tq, 1), lambda qi, ki: (qi, 0)),        # positive counts
            pl.BlockSpec((tq, D), lambda qi, ki: (qi, 0)),        # gathered prototypes
            pl.BlockSpec((tq, 1), lambda qi, ki: (qi, 0)),        # has-prototype mask
        ],
        out_specs=pl.BlockSpec((tq, 128), lambda qi, ki: (qi, 0)),
        scratch_shapes=[pltpu.VMEM((tq, 1), jnp.float32) for _ in range(3)],
    )

    out = pl.pallas_call(
        kernel,
        grid_spec=grid_spec,
        out_shape=jax.ShapeDtypeStruct((B_pad, 128), jnp.float32),
        compiler_params=pltpu.CompilerParams(
            dimension_semantics=("parallel", "arbitrary")),
    )(feats_q, feats_k, labels_col, labels_row, pcnt_col, proto_g, hp_col)

    # tiny glue reductions (drop padded rows; lanes: 0 -> mlpp, 64 -> dist)
    mlpp_rows = out[:B, 0]
    dist_rows = out[:B, 64]
    contrastive = -jnp.sum(mlpp_rows) / B
    proto_loss = jnp.sum(dist_rows) / jnp.maximum(count, 1.0)     # == 0 when count == 0
    total = contrastive + prototype_weight * proto_loss
    return total, contrastive, proto_loss


def _reference(features, prototypes, proto_exists, class_labels,
               temperature, prototype_weight):
    """Pure-JAX reference mirroring the PyTorch module, at the kernel's bf16 input
    precision (f32 math everywhere downstream)."""
    f = features.astype(jnp.bfloat16).astype(jnp.float32)
    p = prototypes.astype(jnp.bfloat16).astype(jnp.float32)
    B = f.shape[0]
    same = (class_labels[:, None] == class_labels[None, :]).astype(jnp.float32)
    logits_mask = 1.0 - jnp.eye(B, dtype=jnp.float32)
    mask = same * logits_mask
    adc = (f @ f.T) / temperature
    logits = adc - jnp.max(adc, axis=1, keepdims=True)
    exp_logits = jnp.exp(logits) * logits_mask
    log_prob = logits - jnp.log(exp_logits.sum(1, keepdims=True) + 1e-12)
    mlpp = (mask * log_prob).sum(1) / (mask.sum(1) + 1e-12)
    contrastive = -mlpp.mean()
    pg = p[class_labels]
    hp = proto_exists[class_labels].astype(jnp.float32)
    dots = jnp.sum(f * pg, axis=1)
    count = jnp.sum(hp)
    proto = jnp.sum((1.0 - dots) * hp) / jnp.maximum(count, 1.0)
    total = contrastive + prototype_weight * proto
    return total, contrastive, proto


if __name__ == "__main__":
    B, D, C = 200, 128, 7
    temperature, prototype_weight = 0.07, 0.5

    key = jax.random.PRNGKey(0)
    kf, kp, kc = jax.random.split(key, 3)

    feats = jax.random.normal(kf, (B, D), dtype=jnp.float32)
    feats = feats / jnp.linalg.norm(feats, axis=1, keepdims=True)   # normalized_projections

    prototypes = jax.random.normal(kp, (C, D), dtype=jnp.float32)
    prototypes = prototypes / jnp.linalg.norm(prototypes, axis=1, keepdims=True)
    proto_exists = jnp.ones((C,), dtype=jnp.bool_)                  # every class has a prototype

    class_labels = jax.random.randint(kc, (B,), 0, C, dtype=jnp.int32)
    # hard_negatives / domain_labels: unused by the reference forward computation.

    ref_total, ref_contrastive, ref_proto = _reference(
        feats, prototypes, proto_exists, class_labels, temperature, prototype_weight)

    # (128,128) exercises a 2x2 grid with a padded edge tile; the defaults collapse
    # to a single 256x256 tile (init + finalize on the same step) at this B.
    for bq, bk in ((128, 128), (512, 256)):
        total, contrastive, proto = jax.block_until_ready(
            protodacl_loss(feats, prototypes, proto_exists, class_labels,
                           temperature=temperature, prototype_weight=prototype_weight,
                           block_q=bq, block_k=bk))
        # tolerance covers bf16 operand rounding + MXU/EUP accumulation differences
        assert jnp.allclose(contrastive, ref_contrastive, atol=2e-2, rtol=2e-2), \
            (bq, bk, contrastive, ref_contrastive)
        assert jnp.allclose(proto, ref_proto, atol=2e-2, rtol=2e-2), \
            (bq, bk, proto, ref_proto)
        assert jnp.allclose(total, ref_total, atol=2e-2, rtol=2e-2), \
            (bq, bk, total, ref_total)

    print("KERNEL_OK")
</pallas_src>

<mosaic_0001>
module attributes {stable_mosaic.version = 11 : i64} {
  func.func @_protodacl_kernel(%arg0: i32, %arg1: i32, %arg2: memref<128x128xbf16, #tpu.memory_space<vmem>>, %arg3: memref<128x128xbf16, #tpu.memory_space<vmem>>, %arg4: memref<128x1xi32, #tpu.memory_space<vmem>>, %arg5: memref<1x128xi32, #tpu.memory_space<vmem>>, %arg6: memref<128x1xf32, #tpu.memory_space<vmem>>, %arg7: memref<128x128xbf16, #tpu.memory_space<vmem>>, %arg8: memref<128x1xf32, #tpu.memory_space<vmem>>, %arg9: memref<128x128xf32, #tpu.memory_space<vmem>>, %arg10: memref<128x1xf32, #tpu.memory_space<vmem>>, %arg11: memref<128x1xf32, #tpu.memory_space<vmem>>, %arg12: memref<128x1xf32, #tpu.memory_space<vmem>>) attributes {dimension_semantics = [#tpu.dimension_semantics<parallel>, #tpu.dimension_semantics<arbitrary>], iteration_bounds = array<i64: 2, 2>, scalar_prefetch = 0 : i64, scratch_operands = 3 : i64, tpu.core_type = #tpu.core_type<tc>, window_params = [{transform_indices = @transform_0, window_bounds = array<i64: 128, 128>}, {transform_indices = @transform_1, window_bounds = array<i64: 128, 128>}, {transform_indices = @transform_2, window_bounds = array<i64: 128, 1>}, {transform_indices = @transform_3, window_bounds = array<i64: 1, 128>}, {transform_indices = @transform_4, window_bounds = array<i64: 128, 1>}, {transform_indices = @transform_5, window_bounds = array<i64: 128, 128>}, {transform_indices = @transform_6, window_bounds = array<i64: 128, 1>}, {transform_indices = @transform_7, window_bounds = array<i64: 128, 128>}]} {
    %c0_i32 = arith.constant 0 : i32
    %0 = arith.cmpi eq, %arg1, %c0_i32 : i32
    %1 = arith.extui %0 : i1 to i32
    %c0_i32_0 = arith.constant 0 : i32
    %2 = arith.cmpi ne, %1, %c0_i32_0 : i32
    scf.if %2 {
      %cst_23 = arith.constant 0.000000e+00 : f32
      %43 = vector.broadcast %cst_23 : f32 to vector<128x1xf32>
      %c0_24 = arith.constant 0 : index
      %c0_25 = arith.constant 0 : index
      %44 = vector.load %arg10[%c0_24, %c0_25] : memref<128x1xf32, #tpu.memory_space<vmem>>, vector<128x1xf32>
      tpu.vector_store %arg10[%c0_24, %c0_25], %43 {strides = array<i32>} : memref<128x1xf32, #tpu.memory_space<vmem>>, vector<128x1xf32>,
      %cst_26 = arith.constant 0.000000e+00 : f32
      %45 = vector.broadcast %cst_26 : f32 to vector<128x1xf32>
      %c0_27 = arith.constant 0 : index
      %c0_28 = arith.constant 0 : index
      %46 = vector.load %arg11[%c0_27, %c0_28] : memref<128x1xf32, #tpu.memory_space<vmem>>, vector<128x1xf32>
      tpu.vector_store %arg11[%c0_27, %c0_28], %45 {strides = array<i32>} : memref<128x1xf32, #tpu.memory_space<vmem>>, vector<128x1xf32>,
    } else {
    }
    %c0 = arith.constant 0 : index
    %c0_1 = arith.constant 0 : index
    %3 = vector.load %arg2[%c0, %c0_1] : memref<128x128xbf16, #tpu.memory_space<vmem>>, vector<128x128xbf16>
    %c0_2 = arith.constant 0 : index
    %c0_3 = arith.constant 0 : index
    %4 = vector.load %arg3[%c0_2, %c0_3] : memref<128x128xbf16, #tpu.memory_space<vmem>>, vector<128x128xbf16>
    %cst = arith.constant dense<0.000000e+00> : vector<128x128xf32>
    %5 = tpu.matmul %3, %4, %cst {dimension_numbers = #tpu.dot_dimension_numbers<[1], [1], [0], [0], [0, 0, 1, 0], [], []>} : vector<128x128xbf16>, vector<128x128xbf16>, vector<128x128xf32> -> vector<128x128xf32>
    %c0_4 = arith.constant 0 : index
    %c0_5 = arith.constant 0 : index
    %6 = vector.load %arg4[%c0_4, %c0_5] : memref<128x1xi32, #tpu.memory_space<vmem>>, vector<128x1xi32>
    %c0_6 = arith.constant 0 : index
    %c0_7 = arith.constant 0 : index
    %7 = vector.load %arg5[%c0_6, %c0_7] : memref<1x128xi32, #tpu.memory_space<vmem>>, vector<1x128xi32>
    %8 = tpu.iota {dimensions = array<i32: 0>} : vector<128x1xi32>
    %c128_i32 = arith.constant 128 : i32
    %9 = arith.muli %arg0, %c128_i32 : i32
    %10 = vector.broadcast %9 : i32 to vector<128x1xi32>
    %11 = arith.addi %8, %10 : vector<128x1xi32>
    %12 = tpu.iota {dimensions = array<i32: 1>} : vector<1x128xi32>
    %c128_i32_8 = arith.constant 128 : i32
    %13 = arith.muli %arg1, %c128_i32_8 : i32
    %14 = vector.broadcast %13 : i32 to vector<1x128xi32>
    %15 = arith.addi %12, %14 : vector<1x128xi32>
    %16 = vector.broadcast %11 : vector<128x1xi32> to vector<128x128xi32>
    %17 = vector.broadcast %15 : vector<1x128xi32> to vector<128x128xi32>
    %18 = arith.cmpi ne, %16, %17 : vector<128x128xi32>
    %19 = vector.broadcast %6 : vector<128x1xi32> to vector<128x128xi32>
    %20 = vector.broadcast %7 : vector<1x128xi32> to vector<128x128xi32>
    %21 = arith.cmpi eq, %19, %20 : vector<128x128xi32>
    %22 = arith.andi %21, %18 : vector<128x128xi1>
    %cst_9 = arith.constant -1.000000e+30 : f32
    %23 = vector.broadcast %cst_9 : f32 to vector<128x128xf32>
    %24 = arith.select %18, %5, %23 : vector<128x128xi1>, vector<128x128xf32>
    %c0_10 = arith.constant 0 : index
    %c0_11 = arith.constant 0 : index
    %25 = vector.load %arg10[%c0_10, %c0_11] : memref<128x1xf32, #tpu.memory_space<vmem>>, vector<128x1xf32>
    %cst_12 = arith.constant 14.2857141 : f32
    %26 = vector.broadcast %cst_12 : f32 to vector<128x128xf32>
    %27 = arith.subf %24, %26 : vector<128x128xf32>
    %28 = math.exp %27 : vector<128x128xf32>
    %cst_13 = arith.constant dense<0.000000e+00> : vector<128xf32>
    %29 = vector.multi_reduction <add>, %28, %cst_13 [1] : vector<128x128xf32> to vector<128xf32>
    %30 = vector.shape_cast %29 : vector<128xf32> to vector<128x1xf32>
    %31 = arith.addf %25, %30 : vector<128x1xf32>
    %c0_14 = arith.constant 0 : index
    %c0_15 = arith.constant 0 : index
    %32 = vector.load %arg10[%c0_14, %c0_15] : memref<128x1xf32, #tpu.memory_space<vmem>>, vector<128x1xf32>
    tpu.vector_store %arg10[%c0_14, %c0_15], %31 {strides = array<i32>} : memref<128x1xf32, #tpu.memory_space<vmem>>, vector<128x1xf32>,
    %c0_16 = arith.constant 0 : index
    %c0_17 = arith.constant 0 : index
    %33 = vector.load %arg11[%c0_16, %c0_17] : memref<128x1xf32, #tpu.memory_space<vmem>>, vector<128x1xf32>
    %cst_18 = arith.constant 0.000000e+00 : f32
    %34 = vector.broadcast %cst_18 : f32 to vector<128x128xf32>
    %35 = arith.select %22, %5, %34 : vector<128x128xi1>, vector<128x128xf32>
    %cst_19 = arith.constant dense<0.000000e+00> : vector<128xf32>
    %36 = vector.multi_reduction <add>, %35, %cst_19 [1] : vector<128x128xf32> to vector<128xf32>
    %37 = vector.shape_cast %36 : vector<128xf32> to vector<128x1xf32>
    %38 = arith.addf %33, %37 : vector<128x1xf32>
    %c0_20 = arith.constant 0 : index
    %c0_21 = arith.constant 0 : index
    %39 = vector.load %arg11[%c0_20, %c0_21] : memref<128x1xf32, #tpu.memory_space<vmem>>, vector<128x1xf32>
    tpu.vector_store %arg11[%c0_20, %c0_21], %38 {strides = array<i32>} : memref<128x1xf32, #tpu.memory_space<vmem>>, vector<128x1xf32>,
    %c1_i32 = arith.constant 1 : i32
    %40 = arith.cmpi eq, %arg1, %c1_i32 : i32
    %41 = arith.extui %40 : i1 to i32
    %c0_i32_22 = arith.constant 0 : i32
    %42 = arith.cmpi ne, %41, %c0_i32_22 : i32
    scf.if %42 {
      %c0_23 = arith.constant 0 : index
      %c0_24 = arith.constant 0 : index
      %43 = vector.load %arg10[%c0_23, %c0_24] : memref<128x1xf32, #tpu.memory_space<vmem>>, vector<128x1xf32>
      %cst_25 = arith.constant -14.2857141 : f32
      %44 = math.exp %cst_25 : f32
      %cst_26 = arith.constant 5.600000e+01 : f32
      %45 = arith.mulf %cst_26, %44 : f32
      %46 = vector.broadcast %45 : f32 to vector<128x1xf32>
      %47 = arith.subf %43, %46 : vector<128x1xf32>
      %cst_27 = arith.constant 9.99999996E-13 : f32
      %48 = vector.broadcast %cst_27 : f32 to vector<128x1xf32>
      %49 = arith.addf %47, %48 : vector<128x1xf32>
      %50 = math.log %49 : vector<128x1xf32>
      %cst_28 = arith.constant 14.2857141 : f32
      %51 = vector.broadcast %cst_28 : f32 to vector<128x1xf32>
      %52 = arith.addf %51, %50 : vector<128x1xf32>
      %c0_29 = arith.constant 0 : index
      %c0_30 = arith.constant 0 : index
      %53 = vector.load %arg6[%c0_29, %c0_30] : memref<128x1xf32, #tpu.memory_space<vmem>>, vector<128x1xf32>
      %c0_31 = arith.constant 0 : index
      %c0_32 = arith.constant 0 : index
      %54 = vector.load %arg11[%c0_31, %c0_32] : memref<128x1xf32, #tpu.memory_space<vmem>>, vector<128x1xf32>
      %55 = arith.mulf %53, %52 : vector<128x1xf32>
      %56 = arith.subf %54, %55 : vector<128x1xf32>
      %cst_33 = arith.constant 9.99999996E-13 : f32
      %57 = vector.broadcast %cst_33 : f32 to vector<128x1xf32>
      %58 = arith.addf %53, %57 : vector<128x1xf32>
      %59 = arith.divf %56, %58 : vector<128x1xf32>
      %60 = arith.extf %3 : vector<128x128xbf16> to vector<128x128xf32>
      %c0_34 = arith.constant 0 : index
      %c0_35 = arith.constant 0 : index
      %61 = vector.load %arg7[%c0_34, %c0_35] : memref<128x128xbf16, #tpu.memory_space<vmem>>, vector<128x128xbf16>
      %62 = arith.extf %61 : vector<128x128xbf16> to vector<128x128xf32>
      %c0_36 = arith.constant 0 : index
      %c0_37 = arith.constant 0 : index
      %63 = vector.load %arg8[%c0_36, %c0_37] : memref<128x1xf32, #tpu.memory_space<vmem>>, vector<128x1xf32>
      %64 = arith.mulf %60, %62 : vector<128x128xf32>
      %cst_38 = arith.constant dense<0.000000e+00> : vector<128xf32>
      %65 = vector.multi_reduction <add>, %64, %cst_38 [1] : vector<128x128xf32> to vector<128xf32>
      %66 = vector.shape_cast %65 : vector<128xf32> to vector<128x1xf32>
      %cst_39 = arith.constant 1.000000e+00 : f32
      %67 = vector.broadcast %cst_39 : f32 to vector<128x1xf32>
      %68 = arith.subf %67, %66 : vector<128x1xf32>
      %69 = arith.mulf %68, %63 : vector<128x1xf32>
      %70 = tpu.iota {dimensions = array<i32: 1>} : vector<128x128xi32>
      %c64_i32 = arith.constant 64 : i32
      %71 = vector.broadcast %c64_i32 : i32 to vector<128x128xi32>
      %72 = arith.cmpi slt, %70, %71 : vector<128x128xi32>
      %73 = vector.shape_cast %59 : vector<128x1xf32> to vector<128x1xf32>
      %74 = vector.broadcast %73 : vector<128x1xf32> to vector<128x128xf32>
      %75 = vector.shape_cast %69 : vector<128x1xf32> to vector<128x1xf32>
      %76 = vector.broadcast %75 : vector<128x1xf32> to vector<128x128xf32>
      %77 = arith.select %72, %74, %76 : vector<128x128xi1>, vector<128x128xf32>
      %c0_40 = arith.constant 0 : index
      %c0_41 = arith.constant 0 : index
      %78 = vector.load %arg9[%c0_40, %c0_41] : memref<128x128xf32, #tpu.memory_space<vmem>>, vector<128x128xf32>
      tpu.vector_store %arg9[%c0_40, %c0_41], %77 {strides = array<i32>} : memref<128x128xf32, #tpu.memory_space<vmem>>, vector<128x128xf32>,
    } else {
    }
    return
  }
  func.func @transform_0(%arg0: i32, %arg1: i32) -> (i32, i32) {
    %c0_i32 = arith.constant 0 : i32
    %c0_i32_0 = arith.constant 0 : i32
    return %arg0, %c0_i32 : i32, i32
  }
  func.func @transform_1(%arg0: i32, %arg1: i32) -> (i32, i32) {
    %c0_i32 = arith.constant 0 : i32
    %c0_i32_0 = arith.constant 0 : i32
    return %arg1, %c0_i32 : i32, i32
  }
  func.func @transform_2(%arg0: i32, %arg1: i32) -> (i32, i32) {
    %c0_i32 = arith.constant 0 : i32
    %c0_i32_0 = arith.constant 0 : i32
    return %arg0, %c0_i32 : i32, i32
  }
  func.func @transform_3(%arg0: i32, %arg1: i32) -> (i32, i32) {
    %c0_i32 = arith.constant 0 : i32
    %c0_i32_0 = arith.constant 0 : i32
    return %c0_i32, %arg1 : i32, i32
  }
  func.func @transform_4(%arg0: i32, %arg1: i32) -> (i32, i32) {
    %c0_i32 = arith.constant 0 : i32
    %c0_i32_0 = arith.constant 0 : i32
    return %arg0, %c0_i32 : i32, i32
  }
  func.func @transform_5(%arg0: i32, %arg1: i32) -> (i32, i32) {
    %c0_i32 = arith.constant 0 : i32
    %c0_i32_0 = arith.constant 0 : i32
    return %arg0, %c0_i32 : i32, i32
  }
  func.func @transform_6(%arg0: i32, %arg1: i32) -> (i32, i32) {
    %c0_i32 = arith.constant 0 : i32
    %c0_i32_0 = arith.constant 0 : i32
    return %arg0, %c0_i32 : i32, i32
  }
  func.func @transform_7(%arg0: i32, %arg1: i32) -> (i32, i32) {
    %c0_i32 = arith.constant 0 : i32
    %c0_i32_0 = arith.constant 0 : i32
    return %arg0, %c0_i32 : i32, i32
  }
}

</mosaic_0001>

<bundles_post_ra>
// kernel: tpu_custom_call.1
= control target key start
LH: loop header
LB: loop body
LE: loop exit
PB: predicated region body
PF: predicated region fallthrough
CT: control target
= control target key end

     0   :  { %s3095_s0 = inlined_call_operand.vmem [shape: bf16[256,128], index: 0, kind: input, shape index: {}]   ;;  %s3096_s1 = inlined_call_operand.vmem [shape: bf16[256,128], index: 1, kind: input, shape index: {}]   ;;  %s3097_s2 = inlined_call_operand.vmem [shape: s32[256,1], index: 2, kind: input, shape index: {}]   ;;  %s3098_s3 = inlined_call_operand.vmem [shape: s32[1,256], index: 3, kind: input, shape index: {}]   ;;  %s3099_s4 = inlined_call_operand.vmem [shape: f32[256,1], index: 4, kind: input, shape index: {}]   ;;  %s3100_s5 = inlined_call_operand.vmem [shape: bf16[256,128], index: 5, kind: input, shape index: {}]   ;;  %s3101_s6 = inlined_call_operand.vmem [shape: f32[256,1], index: 6, kind: input, shape index: {}]   ;;  %s3102_s7 = inlined_call_operand.hbm [shape: f32[256,128], index: 7, kind: output, shape index: {}]  }
   0x1   :  { %3112 = sst [smem:[#allocation17_spill]] %s3095_s0 }
   0x2   :  { %3113 = sst [smem:[#allocation18_spill]] %s3097_s2 }
   0x3   :  { %12 = vsyncpa [#allocation6], 0 }
   0x4   :  { %14 = vsyncpa [#allocation6 + $0x1], 0  ;;  %s2304_s24 = smov 0   ;;  %s2306_s25 = smov 0  }
   0x5   :  { %s2308_s26 = smov 0   ;;  %s2310_s27 = smov 0  }
   0x6   :  { %s2312_s28 = smov 0   ;;  %s2314_s29 = smov 0  }
   0x7   :  { %s2316_s30 = smov 0   ;;  %s2318_s8 = smov 0  }
   0x8 LB: > { %3114 = sst [smem:[#allocation8_spill]] %s2228_s24  ;;  %s1782_s9 = sadd.s32 4294967295, %s2256_s8   ;;  %s2256_s8 = sphi %s2318_s8, %s20_s8   ;;  %s2252_s30 = sphi %s2316_s30, %s3138_s30   ;;  %s2248_s29 = sphi %s2314_s29, %s3137_s29   ;;  %s2244_s28 = sphi %s2312_s28, %s3136_s28   ;;  %s2240_s27 = sphi %s2310_s27, %s3142_s27   ;;  %s2236_s26 = sphi %s2308_s26, %s3141_s26   ;;  %s2232_s25 = sphi %s2306_s25, %s3140_s25   ;;  %s2228_s24 = sphi %s2304_s24, %s3139_s24  }
   0x9   : > { %3115 = sst [smem:[#allocation9_spill]] %s2236_s26  ;;  %s1783_s10 = sadd.s32 4294967294, %s2256_s8  }
   0xa   : > { %3116 = sst [smem:[#allocation10_spill]] %s2248_s29  ;;  %s29_s11 = sadd.s32 1, %s2248_s29 }
   0xb   : > { %3117 = sst [smem:[#allocation11_spill]] %s2252_s30  ;;  %p30_p0 = scmp.ge.s32.totalorder %s29_s11, 2 }
   0xc   : > { %3118 = sst [smem:[#allocation12_spill]] %s2256_s8  ;;  %s32_s12 = sadd.s32 1, %s2252_s30 }
   0xd   : > { %p231_p1 = scmp.ne.s32.totalorder %s2236_s26, %s2232_s25  ;;  %p232_p2 = scmp.eq.s32.totalorder %s1782_s9, 3 }
   0xe   : > { %s3144_s11 = smov (%p30_p0, %s29_s11), 0  ;;  %s3146_s12 = smov (!%p30_p0, %s32_s12), %s2252_s30 }
   0xf   : > { %3119 = sst [smem:[#allocation13_spill]] %s3144_s11  ;;  %p2353_p3 = por %p232_p2, %p231_p1 }
  0x10   : > { %p237_p4 = scmp.ne.s32.totalorder %s2232_s25, %s2228_s24  ;;  %p34_p5 = scmp.ge.s32.totalorder %s3146_s12, 2 }
  0x11   : > { %p238_p6 = scmp.eq.s32.totalorder %s1783_s10, 3  ;;  %p1786_p7 = scmp.ge.s32.totalorder %s2256_s8, 1 }
  0x12   : > { %p316_p8 = scmp.lt.s32.totalorder %s2256_s8, 5  ;;  %s3148_s12 = smov (%p34_p5, %s3146_s12), 0 }
  0x13   : > { %3121 = sst [smem:[#allocation14_spill]] %s3148_s12  ;;  %p2363_p9 = por %p238_p6, %p237_p4 }
  0x14   : > { %p317_p10 = pnand %p1786_p7, %p316_p8  ;;  %s218_s15 = ssub.s32 %s2252_s30, %s3148_s12 }
  0x15   : > { %s3122_s14 = scalar_select %p2363_p9, 1, 0 }
  0x16   : > { %s221_s16 = sadd.s32 1, %s2236_s26  ;;  %p219_p11 = scmp.eq.s32.totalorder %s218_s15, 0 }
  0x17   : > { %3123 = sst [smem:[#allocation15_spill]] %s3122_s14  ;;  %320 = sbr.rel (%p317_p10) target bundleno = 852 (0x354), region = 48 }
  0x18   : > { %s2371_s17 = scalar_select %p219_p11, %s2236_s26, %s221_s16  }
  0x19   : > { %s3105_s18 = sand.u32 (!%p317_p10), 1, %s2232_s25   ;;  %s1788_s19 = sshll.u32 (!%p317_p10), %s2244_s28, 4 }
  0x1a   : > { %3124 = sst [smem:[#allocation16_spill]] %s2371_s17  ;;  %s1787_s20 = sshll.u32 (!%p317_p10), %s3105_s18, 7 }
  0x1b   : > { %p377_p12 = scmp.lt.s32.totalorder (!%p317_p10), %s1788_s19, 31  ;;  %s1790_s21 = sshll.u32 (!%p317_p10), %s2240_s27, 4 }
  0x1c   : > { %p383_p13 = scmp.lt.s32.totalorder (!%p317_p10), %s1790_s21, 31  ;;  %p394_p0 = scmp.lt.s32.totalorder (!%p317_p10), %s2240_s27, 1 }
  0x1d   : > { %s3125_s0 = sld [smem:[#allocation17_spill]] (!%p317_p10)  ;;  %s3126_s2 = sld [smem:[#allocation18_spill]] (!%p317_p10) }
  0x1e   : > { %s3150_s19 = smov (!%p377_p12, %s1788_s19), 31  ;;  %s3152_s21 = smov (!%p383_p13, %s1790_s21), 31 }
  0x1f   : > { %s1789_s22 = sshll.u32 %s3150_s19, 2  ;;  %s1793_s23 = sshll.u32 %s3150_s19, 3 }
  0x20   : > { %s2390_s30 = scalar_select %p394_p0, %s2240_s27, 1 }
  0x21   : > { %s1791_s18 = sshll.u32 %s3152_s21, 2  ;;  %s2395_s26 = scalar_lea.vmem %s3099_s4, %s1793_s23 }
  0x22   : > { %s2400_s9 = scalar_lea.vmem %s3096_s1, %s1791_s18  ;;  %s396_s12 = scalar_lea.vmem %s3098_s3, %s2390_s30 }
  0x23   : > { %s2382_s15 = scalar_lea.vmem %s3125_s0, %s1789_s22  ;;  %s2387_s11 = scalar_lea.vmem %s3126_s2, %s1793_s23 }
  0x24   : > { %s2409_s24 = scalar_lea.vmem %s3100_s5, %s1789_s22  ;;  %s2414_s29 = scalar_lea.vmem %s3101_s6, %s1793_s23 }
  0x25   : > { %s2416_s17 = scalar_lea.vmem [#allocation5], %s1787_s20  ;;  %p1800_p1 = scmp.ne.s32.totalorder %s2240_s27, 0 }
  0x26   : > { %vm421_vm0 = vcmask (!%p1800_p1), 7168   ;;  %v2258_v0 = vmov (!%p1800_p1), 0.0  }
  0x27   : > { %420 = sbr.rel (%p1800_p1) target bundleno = 55 (0x37), region = 52  ;;  %422 = vst.msk [vmem:[#allocation2] sm:$0xff] (!%p1800_p1), %vm421_vm0, %v2258_v0  ;;  %423 = vst.msk [vmem:[#allocation2 + $0x8] sm:$0xff] (!%p1800_p1), %vm421_vm0, %v2258_v0 }
  0x28   : > { %424 = vst.msk [vmem:[#allocation2 + $0x10] sm:$0xff] (!%p1800_p1), %vm421_vm0, %v2258_v0  ;;  %425 = vst.msk [vmem:[#allocation2 + $0x18] sm:$0xff] (!%p1800_p1), %vm421_vm0, %v2258_v0 }
  0x29   : > { %426 = vst.msk [vmem:[#allocation2 + $0x20] sm:$0xff] (!%p1800_p1), %vm421_vm0, %v2258_v0  ;;  %427 = vst.msk [vmem:[#allocation2 + $0x28] sm:$0xff] (!%p1800_p1), %vm421_vm0, %v2258_v0 }
  0x2a   : > { %428 = vst.msk [vmem:[#allocation2 + $0x30] sm:$0xff] (!%p1800_p1), %vm421_vm0, %v2258_v0  ;;  %429 = vst.msk [vmem:[#allocation2 + $0x38] sm:$0xff] (!%p1800_p1), %vm421_vm0, %v2258_v0 }
  0x2b   : > { %430 = vst.msk [vmem:[#allocation2 + $0x40] sm:$0xff] (!%p1800_p1), %vm421_vm0, %v2258_v0  ;;  %431 = vst.msk [vmem:[#allocation2 + $0x48] sm:$0xff] (!%p1800_p1), %vm421_vm0, %v2258_v0 }
  0x2c   : > { %432 = vst.msk [vmem:[#allocation2 + $0x50] sm:$0xff] (!%p1800_p1), %vm421_vm0, %v2258_v0  ;;  %433 = vst.msk [vmem:[#allocation2 + $0x58] sm:$0xff] (!%p1800_p1), %vm421_vm0, %v2258_v0 }
  0x2d   : > { %434 = vst.msk [vmem:[#allocation2 + $0x60] sm:$0xff] (!%p1800_p1), %vm421_vm0, %v2258_v0  ;;  %435 = vst.msk [vmem:[#allocation2 + $0x68] sm:$0xff] (!%p1800_p1), %vm421_vm0, %v2258_v0 }
  0x2e   : > { %436 = vst.msk [vmem:[#allocation2 + $0x70] sm:$0xff] %vm421_vm0, %v2258_v0  ;;  %437 = vst.msk [vmem:[#allocation2 + $0x78] sm:$0xff] %vm421_vm0, %v2258_v0 }
  0x2f   : > { %438 = vst.msk [vmem:[#allocation3] sm:$0xff] %vm421_vm0, %v2258_v0  ;;  %439 = vst.msk [vmem:[#allocation3 + $0x8] sm:$0xff] %vm421_vm0, %v2258_v0 }
  0x30   : > { %440 = vst.msk [vmem:[#allocation3 + $0x10] sm:$0xff] %vm421_vm0, %v2258_v0  ;;  %441 = vst.msk [vmem:[#allocation3 + $0x18] sm:$0xff] %vm421_vm0, %v2258_v0 }
  0x31   : > { %442 = vst.msk [vmem:[#allocation3 + $0x20] sm:$0xff] %vm421_vm0, %v2258_v0  ;;  %443 = vst.msk [vmem:[#allocation3 + $0x28] sm:$0xff] %vm421_vm0, %v2258_v0 }
  0x32   : > { %444 = vst.msk [vmem:[#allocation3 + $0x30] sm:$0xff] %vm421_vm0, %v2258_v0  ;;  %445 = vst.msk [vmem:[#allocation3 + $0x38] sm:$0xff] %vm421_vm0, %v2258_v0 }
  0x33   : > { %446 = vst.msk [vmem:[#allocation3 + $0x40] sm:$0xff] %vm421_vm0, %v2258_v0  ;;  %447 = vst.msk [vmem:[#allocation3 + $0x48] sm:$0xff] %vm421_vm0, %v2258_v0 }
  0x34   : > { %448 = vst.msk [vmem:[#allocation3 + $0x50] sm:$0xff] %vm421_vm0, %v2258_v0  ;;  %449 = vst.msk [vmem:[#allocation3 + $0x58] sm:$0xff] %vm421_vm0, %v2258_v0 }
  0x35   : > { %450 = vst.msk [vmem:[#allocation3 + $0x60] sm:$0xff] %vm421_vm0, %v2258_v0  ;;  %451 = vst.msk [vmem:[#allocation3 + $0x68] sm:$0xff] %vm421_vm0, %v2258_v0 }
  0x36   : > { %452 = vst.msk [vmem:[#allocation3 + $0x70] sm:$0xff] %vm421_vm0, %v2258_v0  ;;  %453 = vst.msk [vmem:[#allocation3 + $0x78] sm:$0xff] %vm421_vm0, %v2258_v0 }
  0x37 PF: > { %v2040_v1 = vld [vmem:[%s2400_s9] sm:$0xff]   ;;  %v2041_v2 = vld [vmem:[%s2400_s9 + $0x8] sm:$0xff]   ;;  %v2259_v3 = vmov 0   ;;  %v2042_v4 = vld [vmem:[%s2400_s9 + $0x10] sm:$0xff]   ;;  %v696_v38 = vlaneseq  ;;  %s1817_s0 = sshll.u32 %s2244_s28, 7  ;;  %s1818_s2 = sshll.u32 %s2240_s27, 7 }
  0x38   : > { %2039 = vset.pattern.permute.xlu1 %v2259_v3  ;;  %2038 = vset.pattern.permute.xlu0 %v2259_v3  ;;  %v2455_v5 = vld [vmem:[%s2382_s15] sm:$0xff]   ;;  %v681_v7 = vld [vmem:[%s2387_s11 + $0x10] sm:$0xff]  ;;  %v682_v9 = vld [vmem:[%s2387_s11 + $0x18] sm:$0xff]  ;;  %v2526_v46 = vstv %s1817_s0  ;;  %p1836_p2 = scmp.ne.s32.totalorder %s2240_s27, 1 }
  0x39   : > { %1914 = vmatprep.subr.bf16.mxu0 %v2040_v1  ;;  %1946 = vmatprep.subr.bf16.mxu1 %v2040_v1  ;;  %v2458_v6 = vld [vmem:[%s2382_s15 + $0x20] sm:$0xff]   ;;  %v680_v10 = vld [vmem:[%s2387_s11 + $0x8] sm:$0xff]  ;;  %v2043_v11 = vld [vmem:[%s2400_s9 + $0x18] sm:$0xff]   ;;  %v2515_v41 = vshrl.u32 %v696_v38, 7  ;;  %v2522_v44 = vand.u32 127, %v696_v38  ;;  %v734_v47 = vstv %s1818_s2 }
  0x3a   : > { %1915 = vmatpush3.bf16.xpose.msra.mxu0 %v2040_v1  ;;  %1954 = vmatpush3.bf16.xpose.msra.mxu1 %v2040_v1  ;;  %v679_v8 = vld [vmem:[%s2387_s11] sm:$0xff]  ;;  %v684_v12 = vld [vmem:[%s2387_s11 + $0x28] sm:$0xff]  ;;  %v686_v14 = vld [vmem:[%s2387_s11 + $0x38] sm:$0xff] }
  0x3b   : > { %1916 = vmatprep.subr.bf16.mxu0 %v2041_v2  ;;  %1947 = vmatprep.subr.bf16.mxu1 %v2041_v2  ;;  %v683_v13 = vld [vmem:[%s2387_s11 + $0x20] sm:$0xff]  ;;  %v685_v15 = vld [vmem:[%s2387_s11 + $0x30] sm:$0xff]  ;;  %v688_v17 = vld [vmem:[%s2387_s11 + $0x48] sm:$0xff]  ;;  %v699_v43 = vadd.s32 16, %v2515_v41  ;;  %v2532_v49 = vadd.s32 %v734_v47, %v2522_v44  ;;  %v700_v50 = vadd.s32 24, %v2515_v41  ;;  %v707_v53 = vadd.s32 80, %v2515_v41 }
  0x3c   : > { %1930 = vmatprep.mubr.bf16.mxu0 %v2455_v5  ;;  %1938 = vmatprep.mubr.bf16.mxu1 %v2458_v6  ;;  %v2044_v16 = vld [vmem:[%s2400_s9 + $0x20] sm:$0xff]   ;;  %v690_v19 = vld [vmem:[%s2387_s11 + $0x58] sm:$0xff]  ;;  %v689_v20 = vld [vmem:[%s2387_s11 + $0x50] sm:$0xff]  ;;  %v708_v55 = vadd.s32 88, %v2515_v41  ;;  %v710_v38 = vadd.s32 104, %v2515_v41 }
  0x3d   : > { %759 = vperm.xlu1 %2039, %v681_v7   ;;  %753 = vperm.xlu0 %2038, %v679_v8   ;;  %v687_v18 = vld [vmem:[%s2387_s11 + $0x40] sm:$0xff]  ;;  %v2045_v21 = vld [vmem:[%s2400_s9 + $0x28] sm:$0xff]   ;;  %v694_v24 = vld [vmem:[%s2387_s11 + $0x78] sm:$0xff]  ;;  %v2529_v48 = vadd.s32 %v2526_v46, %v699_v43  ;;  %v2552_v56 = vadd.s32 %v2526_v46, %v700_v50  ;;  %v725_v59 = vadd.s32 %v2526_v46, %v707_v53 }
  0x3e   : > { %v692_v22 = vld [vmem:[%s2387_s11 + $0x68] sm:$0xff]  ;;  %v691_v23 = vld [vmem:[%s2387_s11 + $0x60] sm:$0xff]  ;;  %v693_v25 = vld [vmem:[%s2387_s11 + $0x70] sm:$0xff]  ;;  %v2560_v63 = vadd.s32 %v2526_v46, %v708_v55  ;;  %v2576_v7 = vadd.s32 %v2526_v46, %v2515_v41 }
  0x3f   : > { %v2046_v26 = vld [vmem:[%s2400_s9 + $0x30] sm:$0xff]   ;;  %v2047_v27 = vld [vmem:[%s2400_s9 + $0x38] sm:$0xff]   ;;  %v2484_v28 = vld [vmem:[%s2382_s15 + $0x8] sm:$0xff]   ;;  %vm738_vm2 = vcmp.ne.s32.totalorder %v2529_v48, %v2532_v49  ;;  %vm739_vm5 = vcmp.ne.s32.totalorder %v2552_v56, %v2532_v49  ;;  %vm746_vm7 = vcmp.ne.s32.totalorder %v725_v59, %v2532_v49 }
  0x40   : > { %v2487_v29 = vld [vmem:[%s2382_s15 + $0x28] sm:$0xff]   ;;  %v2490_v30 = vld [vmem:[%s2382_s15 + $0x10] sm:$0xff]   ;;  %v2500_v32 = vld [vmem:[%s2382_s15 + $0x18] sm:$0xff]   ;;  %vm747_vm10 = vcmp.ne.s32.totalorder %v2560_v63, %v2532_v49  ;;  %vm736_vm13 = vcmp.ne.s32.totalorder %v2576_v7, %v2532_v49 }
  0x41   : > { %762 = vperm.xlu1 %2039, %v682_v9   ;;  %756 = vperm.xlu0 %2038, %v680_v10   ;;  %v2493_v31 = vld [vmem:[%s2382_s15 + $0x30] sm:$0xff]   ;;  %v2503_v33 = vld [vmem:[%s2382_s15 + $0x38] sm:$0xff]   ;;  %v2540_v51 = vld [vmem:[%s396_s12] ss:$0 sm:$0xff]  ;;  %v706_v10 = vadd.s32 72, %v2515_v41 }
  0x42   : > { %1917 = vmatpush3.bf16.xpose.msra.mxu0 %v2041_v2  ;;  %1955 = vmatpush3.bf16.xpose.msra.mxu1 %v2041_v2  ;;  %v698_v2 = vadd.s32 8, %v2515_v41 }
  0x43   : > { %1918 = vmatprep.subr.bf16.mxu0 %v2042_v4  ;;  %1948 = vmatprep.subr.bf16.mxu1 %v2042_v4 }
  0x45   : > { %768 = vperm.xlu1 %2039, %v684_v12   ;;  %765 = vperm.xlu0 %2038, %v683_v13   ;;  %v2593_v13 = vadd.s32 %v2526_v46, %v698_v2  ;;  %v2683_v2 = vadd.s32 %v2526_v46, %v710_v38 }
  0x47   : > { %vm737_vm0 = vcmp.ne.s32.totalorder %v2593_v13, %v2532_v49  ;;  %v981_v13 = vld [vmem:[#allocation3] sm:$0xff] }
  0x49   : > { %774 = vperm.xlu1 %2039, %v686_v14   ;;  %771 = vperm.xlu0 %2038, %v685_v15  }
  0x4a   : > { %1919 = vmatpush3.bf16.xpose.msra.mxu0 %v2042_v4  ;;  %1956 = vmatpush3.bf16.xpose.msra.mxu1 %v2042_v4  ;;  %v705_v4 = vadd.s32 64, %v2515_v41 }
  0x4b   : > { %1920 = vmatprep.subr.bf16.mxu0 %v2043_v11  ;;  %1949 = vmatprep.subr.bf16.mxu1 %v2043_v11 }
  0x4d   : > { %780 = vperm.xlu1 %2039, %v688_v17   ;;  %777 = vperm.xlu0 %2038, %v687_v18  }
  0x51   : > { %786 = vperm.xlu1 %2039, %v690_v19   ;;  %783 = vperm.xlu0 %2038, %v689_v20   ;;  %v703_v19 = vadd.s32 48, %v2515_v41  ;;  %v2611_v20 = vadd.s32 %v2526_v46, %v706_v10 }
  0x52   : > { %1921 = vmatpush3.bf16.xpose.msra.mxu0 %v2043_v11  ;;  %1957 = vmatpush3.bf16.xpose.msra.mxu1 %v2043_v11  ;;  %v712_v11 = vadd.s32 120, %v2515_v41 }
  0x53   : > { %1922 = vmatprep.subr.bf16.mxu0 %v2044_v16  ;;  %1950 = vmatprep.subr.bf16.mxu1 %v2044_v16  ;;  %v721_v43 = vadd.s32 %v2526_v46, %v703_v19 }
  0x55   : > { %792 = vperm.xlu1 %2039, %v692_v22   ;;  %789 = vperm.xlu0 %2038, %v691_v23   ;;  %v2621_v22 = vadd.s32 %v2526_v46, %v712_v11  ;;  %v704_v23 = vadd.s32 56, %v2515_v41 }
  0x59   : > { %798 = vperm.xlu1 %2039, %v694_v24   ;;  %795 = vperm.xlu0 %2038, %v693_v25   ;;  %v702_v25 = vadd.s32 40, %v2515_v41 }
  0x5a   : > { %1923 = vmatpush3.bf16.xpose.msra.mxu0 %v2044_v16  ;;  %1958 = vmatpush3.bf16.xpose.msra.mxu1 %v2044_v16  ;;  %v723_v16 = vadd.s32 %v2526_v46, %v705_v4 }
  0x5b   : > { %1924 = vmatprep.subr.bf16.mxu0 %v2045_v21  ;;  %1951 = vmatprep.subr.bf16.mxu1 %v2045_v21 }
  0x62   : > { %1925 = vmatpush3.bf16.xpose.msra.mxu0 %v2045_v21  ;;  %1959 = vmatpush3.bf16.xpose.msra.mxu1 %v2045_v21 }
  0x63   : > { %1926 = vmatprep.subr.bf16.mxu0 %v2046_v26  ;;  %1952 = vmatprep.subr.bf16.mxu1 %v2046_v26 }
  0x6a   : > { %1927 = vmatpush3.bf16.xpose.msra.mxu0 %v2046_v26  ;;  %1960 = vmatpush3.bf16.xpose.msra.mxu1 %v2046_v26 }
  0x6b   : > { %1928 = vmatprep.subr.bf16.mxu0 %v2047_v27  ;;  %1953 = vmatprep.subr.bf16.mxu1 %v2047_v27 }
  0x72   : > { %1929 = vmatpush3.bf16.xpose.msra.mxu0 %v2047_v27  ;;  %1961 = vmatpush3.bf16.xpose.msra.mxu1 %v2047_v27 }
  0x79   : > { %1931 = vmatmul.mubr.bf16.vlgmr.msra.gmra.mrb[0].mxu0 %v2484_v28  ;;  %1939 = vmatmul.mubr.bf16.vlgmr.msra.gmra.mrb[0].mxu1 %v2487_v29 }
  0x7a   : > { %1934 = vmatprep.mubr.bf16.mxu0 %v2490_v30  ;;  %1942 = vmatprep.mubr.bf16.mxu1 %v2493_v31 }
  0x81   : > { %1935 = vmatmul.mubr.bf16.gmra.mrb[4].mxu0 %v2500_v32  ;;  %1943 = vmatmul.mubr.bf16.gmra.mrb[4].mxu1 %v2503_v33 }
  0xbc   : > { %v760_v34 = vpop.permute.xlu1 %759  ;;  %v2507_v35 = vpop.permute.xlu0 %753 }
  0xbd   : > { %vm806_vm1 = vcmp.eq.s32.totalorder %v760_v34, %v2540_v51  ;;  %vm804_vm12 = vcmp.eq.s32.totalorder %v2507_v35, %v2540_v51  ;;  %v701_v34 = vadd.s32 32, %v2515_v41  ;;  %v2657_v35 = vadd.s32 %v2526_v46, %v704_v23 }
  0xbe   : > { %vm822_vm3 = vmand %vm806_vm1, %vm738_vm2 }
  0xbf   : > { %vm820_vm1 = vmand %vm804_vm12, %vm736_vm13  ;;  %vm742_vm12 = vcmp.ne.s32.totalorder %v721_v43, %v2532_v49 }
  0xc0   : > { %v763_v36 = vpop.permute.xlu1 %762  ;;  %v2509_v37 = vpop.permute.xlu0 %756 }
  0xc1   : > { %vm807_vm4 = vcmp.eq.s32.totalorder %v763_v36, %v2540_v51  ;;  %vm805_vm15 = vcmp.eq.s32.totalorder %v2509_v37, %v2540_v51  ;;  %v2679_v37 = vadd.s32 %v2526_v46, %v701_v34 }
  0xc2   : > { %vm823_vm8 = vmand %vm807_vm4, %vm739_vm5  ;;  %vm744_vm4 = vcmp.ne.s32.totalorder %v723_v16, %v2532_v49 }
  0xc4   : > { %v2511_v39 = vpop.permute.xlu1 %768  ;;  %v2513_v40 = vpop.permute.xlu0 %765 }
  0xc8   : > { %v2519_v42 = vpop.permute.xlu1 %774  ;;  %v2524_v45 = vpop.permute.xlu0 %771 }
  0xcc   : > { %v2542_v52 = vpop.permute.xlu1 %780  ;;  %v2545_v54 = vpop.permute.xlu0 %777 }
  0xd0   : > { %v787_v62 = vpop.permute.xlu1 %786  ;;  %v784_v3 = vpop.permute.xlu0 %783 }
  0xd1   : > { %vm814_vm6 = vcmp.eq.s32.totalorder %v784_v3, %v2540_v51  ;;  %vm815_vm9 = vcmp.eq.s32.totalorder %v787_v62, %v2540_v51 }
  0xd2   : > { %vm830_vm11 = vmand %vm814_vm6, %vm746_vm7  ;;  %vm745_vm6 = vcmp.ne.s32.totalorder %v2611_v20, %v2532_v49 }
  0xd3   : > { %vm831_vm14 = vmand %vm815_vm9, %vm747_vm10 }
  0xd4   : > { %v2596_v15 = vpop.permute.xlu1 %792 }
  0xd8   : > { %v799_v50 = vpop.permute.xlu1 %798 }
 0x14c   : > { %v1932_v57 = vpop.f32.mrb[0].mxu0  ;;  %v1940_v58 = vpop.f32.mrb[0].mxu1 }
 0x14d   : > { %v2555_v60 = vpop.f32.mrb[1].mxu0  ;;  %v2557_v61 = vpop.f32.mrb[1].mxu1  ;;  %v999_v1 = vsel %vm822_vm3, %v1932_v57, 0.0  ;;  %v1007_v17 = vsel %vm830_vm11, %v1940_v58, 0.0  ;;  %v846_v26 = vsel %vm746_vm7, %v1940_v58, -1e+30  ;;  %vm812_vm3 = vcmp.eq.s32.totalorder %v2545_v54, %v2540_v51 }
 0x14e   : > { %v2566_v0 = vpop.f32.mrb[2].mxu1  ;;  %1017 = vadd.xlane.f32.xlu1 %v999_v1  ;;  %v2578_v8 = vpop.f32.mrb[2].mxu0  ;;  %v997_v47 = vsel %vm820_vm1, %v2555_v60, 0.0  ;;  %v838_v53 = vsel %vm738_vm2, %v1932_v57, -1e+30  ;;  %vm751_vm7 = vcmp.ne.s32.totalorder %v2621_v22, %v2532_v49  ;;  %vm813_vm2 = vcmp.eq.s32.totalorder %v2542_v52, %v2540_v51  ;;  %vm828_vm9 = vmand %vm812_vm3, %vm744_vm4 }
 0x14f   : > { %v2580_v9 = vpop.f32.mrb[3].mxu1  ;;  %v2590_v12 = vpop.f32.mrb[3].mxu0  ;;  %v1000_v14 = vsel %vm823_vm8, %v2578_v8, 0.0  ;;  %v1008_v24 = vsel %vm831_vm14, %v2566_v0, 0.0  ;;  %vm821_vm8 = vmand %vm805_vm15, %vm737_vm0  ;;  %v1830_v48 = vadd.f32 -14.285714, %v846_v26  ;;  %v2672_v58 = vadd.s32 %v2526_v46, %v702_v25 }
 0x150   : > { %1019 = vadd.xlane.f32.xlu0 %v1000_v14  ;;  %v998_v59 = vsel %vm821_vm8, %v2590_v12, 0.0  ;;  %v844_v62 = vsel %vm744_vm4, %v2557_v61, -1e+30  ;;  %v709_v1 = vadd.s32 96, %v2515_v41  ;;  %vm810_vm11 = vcmp.eq.s32.totalorder %v2524_v45, %v2540_v51  ;;  %vm829_vm1 = vmand %vm813_vm2, %vm745_vm6 }
 0x151   : > { %v1822_v3 = vadd.f32 -14.285714, %v838_v53  ;;  %v1005_v11 = vsel %vm828_vm9, %v2557_v61, 0.0  ;;  %vm819_vm14 = vcmp.eq.s32.totalorder %v799_v50, %v2540_v51  ;;  %v836_v54 = vsel %vm736_vm13, %v2555_v60, -1e+30  ;;  %vm826_vm8 = vmand %vm810_vm11, %vm742_vm12 }
 0x152   : > { %1033 = vadd.xlane.f32.xlu1 %v1007_v17  ;;  %v711_v14 = vadd.s32 112, %v2515_v41  ;;  %vm743_vm15 = vcmp.ne.s32.totalorder %v2657_v35, %v2532_v49  ;;  %vm811_vm3 = vcmp.eq.s32.totalorder %v2519_v42, %v2540_v51  ;;  %v904_v61 = vmul.f32 1.442695, %v1830_v48 }
 0x153   : > { %v1828_v16 = vadd.f32 -14.285714, %v844_v62  ;;  %v1006_v60 = vsel %vm829_vm1, %v2580_v9, 0.0  ;;  %vm808_vm13 = vcmp.eq.s32.totalorder %v2513_v40, %v2540_v51  ;;  %v837_v41 = vsel %vm737_vm0, %v2590_v12, -1e+30  ;;  %vm2739_vm0 = vmand %vm819_vm14, %vm751_vm7 }
 0x154   : > { %v2607_v18 = vpop.f32.mrb[4].mxu1  ;;  %v2618_v21 = vpop.f32.mrb[4].mxu0  ;;  %1035 = vadd.xlane.f32.xlu0 %v1008_v24  ;;  %v2722_v7 = vadd.s32 %v2526_v46, %v709_v1  ;;  %vm741_vm4 = vcmp.ne.s32.totalorder %v2672_v58, %v2532_v49  ;;  %v888_v52 = vmul.f32 1.442695, %v1822_v3  ;;  %v1820_v17 = vadd.f32 -14.285714, %v836_v54  ;;  %vm827_vm11 = vmand %vm811_vm3, %vm743_vm15 }
 0x155   : > { %v2632_v27 = vpop.f32.mrb[5].mxu0  ;;  %v2635_v36 = vpop.f32.mrb[5].mxu1  ;;  %vm740_vm2 = vcmp.ne.s32.totalorder %v2679_v37, %v2532_v49  ;;  %v1003_v12 = vsel %vm826_vm8, %v2618_v21, 0.0  ;;  %vm809_vm9 = vcmp.eq.s32.totalorder %v2511_v39, %v2540_v51  ;;  %v839_v45 = vsel %vm739_vm5, %v2578_v8, -1e+30 }
 0x156   : > { %1013 = vadd.xlane.f32.xlu1 %v997_v47  ;;  %v2667_v55 = vpop.f32.mrb[6].mxu1  ;;  %v2669_v57 = vpop.f32.mrb[6].mxu0  ;;  %v2750_v19 = vadd.s32 %v2526_v46, %v711_v14  ;;  %2064 = vpow2.f32 %v904_v61  ;;  %v900_v25 = vmul.f32 1.442695, %v1828_v16  ;;  %v1821_v56 = vadd.f32 -14.285714, %v837_v41  ;;  %vm824_vm1 = vmand %vm808_vm13, %vm740_vm2 }
 0x157   : > { %v2693_v4 = vpop.f32.mrb[7].mxu0  ;;  %v2695_v10 = vpop.f32.mrb[7].mxu1  ;;  %v1012_v23 = vsel %vm2739_vm0, %v2667_v55, 0.0  ;;  %v1004_v8 = vsel %vm827_vm11, %v2669_v57, 0.0  ;;  %v842_v46 = vsel %vm742_vm12, %v2618_v21, -1e+30  ;;  %vm748_vm14 = vcmp.ne.s32.totalorder %v2722_v7, %v2532_v49  ;;  %vm825_vm13 = vmand %vm809_vm9, %vm741_vm4 }
 0x158   : > { %1015 = vadd.xlane.f32.xlu0 %v998_v59  ;;  %v790_v24 = vpop.permute.xlu0 %789  ;;  %2066 = vpow2.f32 %v888_v52  ;;  %v884_v42 = vmul.f32 1.442695, %v1820_v17  ;;  %v1823_v26 = vadd.f32 -14.285714, %v839_v45  ;;  %v1001_v34 = vsel %vm824_vm1, %v2632_v27, 0.0 }
 0x159   : > { %vm816_vm5 = vcmp.eq.s32.totalorder %v790_v24, %v2540_v51  ;;  %vm817_vm3 = vcmp.eq.s32.totalorder %v2596_v15, %v2540_v51  ;;  %v847_v21 = vsel %vm747_vm10, %v2566_v0, -1e+30  ;;  %vm750_vm12 = vcmp.ne.s32.totalorder %v2750_v19, %v2532_v49  ;;  %v991_v19 = vld [vmem:[#allocation3 + $0x50] sm:$0xff] }
 0x15a   : > { %1029 = vadd.xlane.f32.xlu1 %v1005_v11  ;;  %vm749_vm8 = vcmp.ne.s32.totalorder %v2683_v2, %v2532_v49  ;;  %2068 = vpow2.f32 %v900_v25  ;;  %v886_v40 = vmul.f32 1.442695, %v1821_v56  ;;  %v1826_v38 = vadd.f32 -14.285714, %v842_v46  ;;  %vm832_vm10 = vmand %vm816_vm5, %vm748_vm14 }
 0x15b   : > { %v1002_v63 = vsel %vm825_vm13, %v2693_v4, 0.0  ;;  %v850_v0 = vsel %vm750_vm12, %v2607_v18, -1e+30  ;;  %2070 = vpow2.f32 %v884_v42  ;;  %v1831_v39 = vadd.f32 -14.285714, %v847_v21  ;;  %vm833_vm9 = vmand %vm817_vm3, %vm749_vm8 }
 0x15c   : > { %1031 = vadd.xlane.f32.xlu0 %v1006_v60  ;;  %v890_v43 = vmul.f32 1.442695, %v1823_v26  ;;  %v1009_v47 = vsel %vm832_vm10, %v2635_v36, 0.0  ;;  %v845_v50 = vsel %vm745_vm6, %v2580_v9, -1e+30  ;;  %2072 = vpow2.f32 %v886_v40 }
 0x15d   : > { %v1834_v53 = vadd.f32 -14.285714, %v850_v0  ;;  %v896_v48 = vmul.f32 1.442695, %v1826_v38  ;;  %v1010_v59 = vsel %vm833_vm9, %v2695_v10, 0.0 }
 0x15e   : > { %1025 = vadd.xlane.f32.xlu1 %v1003_v12  ;;  %v840_v62 = vsel %vm740_vm2, %v2632_v27, -1e+30  ;;  %v906_v20 = vmul.f32 1.442695, %v1831_v39  ;;  %2074 = vpow2.f32 %v890_v43  ;;  %v1829_v1 = vadd.f32 -14.285714, %v845_v50 }
 0x15f   : > { %v843_v15 = vsel %vm743_vm15, %v2669_v57, -1e+30  ;;  %v912_v11 = vmul.f32 1.442695, %v1834_v53  ;;  %2076 = vpow2.f32 %v896_v48  ;;  %v1824_v54 = vadd.f32 -14.285714, %v840_v62 }
 0x160   : > { %1027 = vadd.xlane.f32.xlu0 %v1004_v8  ;;  %v2065_v9 = vpop.eup %2064  ;;  %v848_v27 = vsel %vm748_vm14, %v2635_v36, -1e+30  ;;  %2078 = vpow2.f32 %v906_v20  ;;  %v902_v14 = vmul.f32 1.442695, %v1829_v1  ;;  %v1827_v61 = vadd.f32 -14.285714, %v843_v15 }
 0x161   : > { %v851_v35 = vsel %vm751_vm7, %v2667_v55, -1e+30  ;;  %2080 = vpow2.f32 %v912_v11  ;;  %v892_v16 = vmul.f32 1.442695, %v1824_v54  ;;  %v1832_v60 = vadd.f32 -14.285714, %v848_v27 }
 0x162   : > { %1021 = vadd.xlane.f32.xlu1 %v1001_v34  ;;  %v2067_v3 = vpop.eup %2066  ;;  %2082 = vpow2.f32 %v902_v14  ;;  %v1835_v7 = vadd.f32 -14.285714, %v851_v35  ;;  %v898_v36 = vmul.f32 1.442695, %v1827_v61  ;;  %v841_v52 = vsel %vm741_vm4, %v2693_v4, -1e+30  ;;  %v796_v34 = vpop.permute.xlu0 %795 }
 0x163   : > { %2084 = vpow2.f32 %v892_v16  ;;  %v908_v22 = vmul.f32 1.442695, %v1832_v60  ;;  %v1825_v24 = vadd.f32 -14.285714, %v841_v52  ;;  %v849_v25 = vsel %vm749_vm8, %v2695_v10, -1e+30 }
 0x164   : > { %1023 = vadd.xlane.f32.xlu0 %v1002_v63  ;;  %v2069_v37 = vpop.eup %2068  ;;  %v914_v45 = vmul.f32 1.442695, %v1835_v7  ;;  %2086 = vpow2.f32 %v898_v36  ;;  %v1833_v8 = vadd.f32 -14.285714, %v849_v25  ;;  %vm818_vm6 = vcmp.eq.s32.totalorder %v796_v34, %v2540_v51  ;;  %v983_v51 = vld [vmem:[#allocation3 + $0x10] sm:$0xff]  ;;  %v984_v43 = vld [vmem:[#allocation3 + $0x18] sm:$0xff] }
 0x165   : > { %v2071_v57 = vpop.eup %2070  ;;  %2088 = vpow2.f32 %v908_v22  ;;  %v894_v4 = vmul.f32 1.442695, %v1825_v24  ;;  %vm834_vm7 = vmand %vm818_vm6, %vm750_vm12  ;;  %vm964_vm15 = vcmask 7168   ;;  %v992_v50 = vld [vmem:[#allocation3 + $0x58] sm:$0xff]  ;;  %v989_v20 = vld [vmem:[#allocation3 + $0x40] sm:$0xff]  ;;  %vm1433_vm4 = vcmp.lt.s32.totalorder (!%p1836_p2), %v2522_v44, 64 }
 0x166   : > { %1037 = vadd.xlane.f32.xlu1 %v1009_v47  ;;  %v2073_v41 = vpop.eup %2072  ;;  %2090 = vpow2.f32 %v914_v45  ;;  %v910_v26 = vmul.f32 1.442695, %v1833_v8  ;;  %v1011_v40 = vsel %vm834_vm7, %v2607_v18, 0.0  ;;  %v987_v27 = vld [vmem:[#allocation3 + $0x30] sm:$0xff]  ;;  %v988_v61 = vld [vmem:[#allocation3 + $0x38] sm:$0xff]  ;;  %v985_v16 = vld [vmem:[#allocation3 + $0x20] sm:$0xff] }
 0x167   : > { %2092 = vpow2.f32 %v894_v4  ;;  %v986_v7 = vld [vmem:[#allocation3 + $0x28] sm:$0xff]  ;;  %v854_v8 = vld [vmem:[#allocation2 + $0x10] sm:$0xff] }
 0x168   : > { %1039 = vadd.xlane.f32.xlu0 %v1010_v59  ;;  %v2075_v17 = vpop.eup %2074  ;;  %2094 = vpow2.f32 %v910_v26  ;;  %v982_v59 = vld [vmem:[#allocation3 + $0x8] sm:$0xff]  ;;  %v860_v26 = vld [vmem:[#allocation2 + $0x40] sm:$0xff] }
 0x169   : > { %v2077_v12 = vpop.eup %2076  ;;  %v994_v45 = vld [vmem:[#allocation3 + $0x68] sm:$0xff] }
 0x16a   : > { %936 = vadd.xlane.f32.xlu1 %v2065_v9  ;;  %v2079_v56 = vpop.eup %2078 }
 0x16b   : > { %v2081_v58 = vpop.eup %2080 }
 0x16c   : > { %920 = vadd.xlane.f32.xlu0 %v2067_v3  ;;  %v2083_v46 = vpop.eup %2082  ;;  %v990_v3 = vld [vmem:[#allocation3 + $0x48] sm:$0xff] }
 0x16d   : > { %v2085_v42 = vpop.eup %2084 }
 0x16e   : > { %932 = vadd.xlane.f32.xlu1 %v2069_v37  ;;  %v2087_v21 = vpop.eup %2086 }
 0x16f   : > { %v2089_v2 = vpop.eup %2088 }
 0x170   : > { %916 = vadd.xlane.f32.xlu0 %v2071_v57  ;;  %v2091_v10 = vpop.eup %2090 }
 0x171   : > { %v2093_v38 = vpop.eup %2092 }
 0x172   : > { %918 = vadd.xlane.f32.xlu1 %v2073_v41  ;;  %v2095_v63 = vpop.eup %2094 }
 0x174   : > { %922 = vadd.xlane.f32.xlu0 %v2075_v17  ;;  %v993_v17 = vld [vmem:[#allocation3 + $0x60] sm:$0xff] }
 0x176   : > { %928 = vadd.xlane.f32.xlu1 %v2077_v12 }
 0x178   : > { %938 = vadd.xlane.f32.xlu0 %v2079_v56  ;;  %v862_v56 = vld [vmem:[#allocation2 + $0x50] sm:$0xff] }
 0x17a   : > { %944 = vadd.xlane.f32.xlu1 %v2081_v58 }
 0x17c   : > { %934 = vadd.xlane.f32.xlu0 %v2083_v46 }
 0x17e   : > { %924 = vadd.xlane.f32.xlu1 %v2085_v42 }
 0x180   : > { %930 = vadd.xlane.f32.xlu0 %v2087_v21 }
 0x182   : > { %940 = vadd.xlane.f32.xlu1 %v2089_v2  ;;  %v852_v2 = vld [vmem:[#allocation2] sm:$0xff] }
 0x184   : > { %946 = vadd.xlane.f32.xlu0 %v2091_v10 }
 0x186   : > { %1041 = vadd.xlane.f32.xlu1 %v1011_v40 }
 0x188   : > { %926 = vadd.xlane.f32.xlu0 %v2093_v38  ;;  %v853_v38 = vld [vmem:[#allocation2 + $0x8] sm:$0xff] }
 0x18c   : > { %942 = vadd.xlane.f32.xlu0 %v2095_v63 }
 0x190   : > { %1043 = vadd.xlane.f32.xlu0 %v1012_v23 }
 0x1db   : > { %v1018_v0 = vpop.xlane.xlu1 %1017 }
 0x1dc   : > { %v1047_v39 = vadd.f32 %v1018_v0, %v983_v51  ;;  %v855_v0 = vld [vmem:[#allocation2 + $0x18] sm:$0xff] }
 0x1dd   : > { %v1020_v49 = vpop.xlane.xlu0 %1019 }
 0x1de   : > { %1063 = vst.msk [vmem:[#allocation3 + $0x10] sm:$0xff] %vm964_vm15, %v1047_v39  ;;  %v1048_v18 = vadd.f32 %v1020_v49, %v984_v43  ;;  %v858_v49 = vld [vmem:[#allocation2 + $0x30] sm:$0xff] }
 0x1df   : > { %v1034_v47 = vpop.xlane.xlu1 %1033 }
 0x1e0   : > { %1064 = vst.msk [vmem:[#allocation3 + $0x18] sm:$0xff] %vm964_vm15, %v1048_v18  ;;  %v1055_v53 = vadd.f32 %v1034_v47, %v991_v19  ;;  %v863_v47 = vld [vmem:[#allocation2 + $0x58] sm:$0xff] }
 0x1e1   : > { %v1036_v48 = vpop.xlane.xlu0 %1035 }
 0x1e2   : > { %1071 = vst.msk [vmem:[#allocation3 + $0x50] sm:$0xff] %vm964_vm15, %v1055_v53  ;;  %v1056_v55 = vadd.f32 %v1036_v48, %v992_v50  ;;  %v866_v48 = vld [vmem:[#allocation2 + $0x70] sm:$0xff] }
 0x1e3   : > { %v1014_v23 = vpop.xlane.xlu1 %1013 }
 0x1e4   : > { %1072 = vst.msk [vmem:[#allocation3 + $0x58] sm:$0xff] %vm964_vm15, %v1056_v55  ;;  %v1045_v62 = vadd.f32 %v1014_v23, %v981_v13  ;;  %v861_v23 = vld [vmem:[#allocation2 + $0x48] sm:$0xff] }
 0x1e5   : > { %v1016_v9 = vpop.xlane.xlu0 %1015 }
 0x1e6   : > { %1061 = vst.msk [vmem:[#allocation3] sm:$0xff] %vm964_vm15, %v1045_v62  ;;  %v1046_v1 = vadd.f32 %v1016_v9, %v982_v59  ;;  %v856_v9 = vld [vmem:[#allocation2 + $0x20] sm:$0xff] }
 0x1e7   : > { %v1030_v15 = vpop.xlane.xlu1 %1029 }
 0x1e8   : > { %1062 = vst.msk [vmem:[#allocation3 + $0x8] sm:$0xff] %vm964_vm15, %v1046_v1  ;;  %v1053_v11 = vadd.f32 %v1030_v15, %v989_v20  ;;  %v859_v15 = vld [vmem:[#allocation2 + $0x38] sm:$0xff] }
 0x1e9   : > { %v1032_v54 = vpop.xlane.xlu0 %1031 }
 0x1ea   : > { %1069 = vst.msk [vmem:[#allocation3 + $0x40] sm:$0xff] %vm964_vm15, %v1053_v11  ;;  %v1054_v37 = vadd.f32 %v1032_v54, %v990_v3  ;;  %v864_v54 = vld [vmem:[#allocation2 + $0x60] sm:$0xff] }
 0x1eb   : > { %v1026_v14 = vpop.xlane.xlu1 %1025 }
 0x1ec   : > { %1070 = vst.msk [vmem:[#allocation3 + $0x48] sm:$0xff] %vm964_vm15, %v1054_v37  ;;  %v1051_v35 = vadd.f32 %v1026_v14, %v987_v27  ;;  %v867_v14 = vld [vmem:[#allocation2 + $0x78] sm:$0xff] }
 0x1ed   : > { %v1028_v57 = vpop.xlane.xlu0 %1027 }
 0x1ee   : > { %1067 = vst.msk [vmem:[#allocation3 + $0x30] sm:$0xff] %vm964_vm15, %v1051_v35  ;;  %v1052_v60 = vadd.f32 %v1028_v57, %v988_v61  ;;  %v995_v57 = vld [vmem:[#allocation3 + $0x70] sm:$0xff] }
 0x1ef   : > { %v1022_v41 = vpop.xlane.xlu1 %1021 }
 0x1f0   : > { %1068 = vst.msk [vmem:[#allocation3 + $0x38] sm:$0xff] %vm964_vm15, %v1052_v60  ;;  %v1049_v36 = vadd.f32 %v1022_v41, %v985_v16  ;;  %v857_v41 = vld [vmem:[#allocation2 + $0x28] sm:$0xff] }
 0x1f1   : > { %v1024_v52 = vpop.xlane.xlu0 %1023 }
 0x1f2   : > { %1065 = vst.msk [vmem:[#allocation3 + $0x20] sm:$0xff] %vm964_vm15, %v1049_v36  ;;  %v1050_v22 = vadd.f32 %v1024_v52, %v986_v7 }
 0x1f3   : > { %v1038_v12 = vpop.xlane.xlu1 %1037 }
 0x1f4   : > { %1066 = vst.msk [vmem:[#allocation3 + $0x28] sm:$0xff] %vm964_vm15, %v1050_v22  ;;  %v1057_v24 = vadd.f32 %v1038_v12, %v993_v17  ;;  %v865_v17 = vld [vmem:[#allocation2 + $0x68] sm:$0xff] }
 0x1f5   : > { %v1040_v25 = vpop.xlane.xlu0 %1039 }
 0x1f6   : > { %1073 = vst.msk [vmem:[#allocation3 + $0x60] sm:$0xff] %vm964_vm15, %v1057_v24  ;;  %v1058_v58 = vadd.f32 %v1040_v25, %v994_v45  ;;  %v996_v45 = vld [vmem:[#allocation3 + $0x78] sm:$0xff] }
 0x1f7   : > { %v937_v4 = vpop.xlane.xlu1 %936 }
 0x1f8   : > { %1074 = vst.msk [vmem:[#allocation3 + $0x68] sm:$0xff] %vm964_vm15, %v1058_v58  ;;  %v958_v46 = vadd.f32 %v937_v4, %v862_v56  ;;  %v1289_v56 = vunpack.c.l.bf16 (!%p1836_p2), %v2455_v5  ;;  %v1860_v58 = vld [vmem:[%s2409_s24] sm:$0xff] (!%p1836_p2)   ;;  %v1291_v4 = vunpack.c.l.bf16 (!%p1836_p2), %v2484_v28 }
 0x1f9   : > { %v921_v42 = vpop.xlane.xlu0 %920 }
 0x1fa   : > { %975 = vst.msk [vmem:[#allocation2 + $0x50] sm:$0xff] %vm964_vm15, %v958_v46  ;;  %v950_v34 = vadd.f32 %v921_v42, %v854_v8  ;;  %v1891_v8 = vld [vmem:[%s2409_s24 + $0x8] sm:$0xff] (!%p1836_p2)   ;;  %v1290_v46 = vunpack.c.h.bf16 (!%p1836_p2), %v2455_v5  ;;  %v1292_v42 = vunpack.c.h.bf16 (!%p1836_p2), %v2484_v28  ;;  %v1294_v5 = vunpack.c.h.bf16 (!%p1836_p2), %v2490_v30  ;;  %v1893_v28 = vld [vmem:[%s2409_s24 + $0x18] sm:$0xff] (!%p1836_p2)  }
 0x1fb   : > { %v933_v21 = vpop.xlane.xlu1 %932 }
 0x1fc   : > { %967 = vst.msk [vmem:[#allocation2 + $0x10] sm:$0xff] %vm964_vm15, %v950_v34  ;;  %v956_v10 = vadd.f32 %v933_v21, %v860_v26  ;;  %v1861_v26 = vunpack.c.l.bf16 (!%p1836_p2), %v1860_v58  ;;  %v1865_v34 = vunpack.c.l.bf16 (!%p1836_p2), %v1891_v8  ;;  %v1862_v21 = vunpack.c.h.bf16 (!%p1836_p2), %v1860_v58 }
 0x1fd   : > { %v917_v40 = vpop.xlane.xlu0 %916 }
 0x1fe   : > { %973 = vst.msk [vmem:[#allocation2 + $0x40] sm:$0xff] %vm964_vm15, %v956_v10  ;;  %v948_v63 = vadd.f32 %v917_v40, %v852_v2  ;;  %v1866_v2 = vunpack.c.h.bf16 (!%p1836_p2), %v1891_v8  ;;  %v1892_v10 = vld [vmem:[%s2409_s24 + $0x10] sm:$0xff] (!%p1836_p2)   ;;  %v1353_v40 = vmul.f32 (!%p1836_p2), %v1861_v26, %v1289_v56  ;;  %v1303_v56 = vunpack.c.l.bf16 (!%p1836_p2), %v2503_v33  ;;  %v1178_v26 = vld [vmem:[%s2395_s26 + $0x8] sm:$0xff] (!%p1836_p2) }
 0x1ff   : > { %v919_v51 = vpop.xlane.xlu1 %918  ;;  %v1304_v8 = vunpack.c.h.bf16 (!%p1836_p2), %v2503_v33 }
 0x200   : > { %965 = vst.msk [vmem:[#allocation2] sm:$0xff] %vm964_vm15, %v948_v63  ;;  %v949_v39 = vadd.f32 %v919_v51, %v853_v38  ;;  %v1355_v38 = vmul.f32 (!%p1836_p2), %v1865_v34, %v1291_v4  ;;  %v1293_v63 = vunpack.c.l.bf16 (!%p1836_p2), %v2490_v30  ;;  %v1869_v51 = vunpack.c.l.bf16 (!%p1836_p2), %v1892_v10  ;;  %1369 = vadd.xlane.f32.xlu0 (!%p1836_p2), %v1353_v40 }
 0x201   : > { %v923_v43 = vpop.xlane.xlu0 %922  ;;  %v1297_v30 = vunpack.c.l.bf16 (!%p1836_p2), %v2458_v6  ;;  %v1242_v40 = vadd.f32 (!%p1836_p2), 1e-12, %v1178_v26 }
 0x202   : > { %966 = vst.msk [vmem:[#allocation2 + $0x8] sm:$0xff] %vm964_vm15, %v949_v39  ;;  %v951_v19 = vadd.f32 %v923_v43, %v855_v0  ;;  %1373 = vadd.xlane.f32.xlu1 (!%p1836_p2), %v1355_v38  ;;  %v1354_v0 = vmul.f32 (!%p1836_p2), %v1862_v21, %v1290_v46  ;;  %v1356_v39 = vmul.f32 (!%p1836_p2), %v1866_v2, %v1292_v42  ;;  %v1870_v43 = vunpack.c.h.bf16 (!%p1836_p2), %v1892_v10 }
 0x203   : > { %v929_v18 = vpop.xlane.xlu1 %928 }
 0x204   : > { %968 = vst.msk [vmem:[#allocation2 + $0x18] sm:$0xff] %vm964_vm15, %v951_v19  ;;  %v954_v50 = vadd.f32 %v929_v18, %v858_v49  ;;  %v1295_v49 = vunpack.c.l.bf16 (!%p1836_p2), %v2500_v32  ;;  %v1873_v19 = vunpack.c.l.bf16 (!%p1836_p2), %v1893_v28  ;;  %1371 = vadd.xlane.f32.xlu0 (!%p1836_p2), %v1354_v0 }
 0x205   : > { %v939_v53 = vpop.xlane.xlu0 %938 }
 0x206   : > { %971 = vst.msk [vmem:[#allocation2 + $0x30] sm:$0xff] %vm964_vm15, %v954_v50  ;;  %v959_v13 = vadd.f32 %v939_v53, %v863_v47  ;;  %1375 = vadd.xlane.f32.xlu1 (!%p1836_p2), %v1356_v39  ;;  %v1357_v47 = vmul.f32 (!%p1836_p2), %v1869_v51, %v1293_v63  ;;  %v1358_v50 = vmul.f32 (!%p1836_p2), %v1870_v43, %v1294_v5  ;;  %v1296_v53 = vunpack.c.h.bf16 (!%p1836_p2), %v2500_v32  ;;  %v1179_v51 = vld [vmem:[%s2395_s26 + $0x10] sm:$0xff] (!%p1836_p2) }
 0x207   : > { %v945_v55 = vpop.xlane.xlu1 %944  ;;  %v1081_v39 = vld [vmem:[#allocation2] sm:$0xff] (!%p1836_p2) }
 0x208   : > { %976 = vst.msk [vmem:[#allocation2 + $0x58] sm:$0xff] %vm964_vm15, %v959_v13  ;;  %v962_v59 = vadd.f32 %v945_v55, %v866_v48  ;;  %v1874_v48 = vunpack.c.h.bf16 (!%p1836_p2), %v1893_v28  ;;  %v1894_v13 = vld [vmem:[%s2409_s24 + $0x20] sm:$0xff] (!%p1836_p2)   ;;  %v1083_v55 = vld [vmem:[#allocation2 + $0x10] sm:$0xff] (!%p1836_p2)  ;;  %1377 = vadd.xlane.f32.xlu0 (!%p1836_p2), %v1357_v47  ;;  %v2906_v28 = vld [vmem:[%s2395_s26 + $0x18] sm:$0xff] (!%p1836_p2) }
 0x209   : > { %v935_v62 = vpop.xlane.xlu0 %934  ;;  %v1082_v18 = vld [vmem:[#allocation2 + $0x8] sm:$0xff] (!%p1836_p2)  ;;  %v1878_v32 = vunpack.c.h.bf16 (!%p1836_p2), %v1894_v13 }
 0x20a   : > { %979 = vst.msk [vmem:[#allocation2 + $0x70] sm:$0xff] %vm964_vm15, %v962_v59  ;;  %v957_v20 = vadd.f32 %v935_v62, %v861_v23  ;;  %v1838_v23 = vadd.f32 (!%p1836_p2), -3.4993e-05, %v1082_v18  ;;  %v1359_v59 = vmul.f32 (!%p1836_p2), %v1873_v19, %v1295_v49  ;;  %v1877_v62 = vunpack.c.l.bf16 (!%p1836_p2), %v1894_v13  ;;  %1379 = vadd.xlane.f32.xlu1 (!%p1836_p2), %v1358_v50 }
 0x20b   : > { %v925_v1 = vpop.xlane.xlu1 %924  ;;  %v1243_v19 = vadd.f32 (!%p1836_p2), 1e-12, %v1179_v51  ;;  %v1837_v18 = vadd.f32 (!%p1836_p2), -3.4993e-05, %v1081_v39 }
 0x20c   : > { %974 = vst.msk [vmem:[#allocation2 + $0x48] sm:$0xff] %vm964_vm15, %v957_v20  ;;  %v952_v3 = vadd.f32 %v925_v1, %v856_v9  ;;  %v2260_v9 = vmov (!%p1836_p2), 0   ;;  %v1839_v20 = vadd.f32 (!%p1836_p2), -3.4993e-05, %v1083_v55  ;;  %v1360_v1 = vmul.f32 (!%p1836_p2), %v1874_v48, %v1296_v53  ;;  %1381 = vadd.xlane.f32.xlu0 (!%p1836_p2), %v1359_v59  ;;  %v1089_v53 = vld [vmem:[#allocation2 + $0x40] sm:$0xff] (!%p1836_p2) }
 0x20d   : > { %v931_v11 = vpop.xlane.xlu0 %930  ;;  %2097 = vset.pattern.permute.xlu1 (!%p1836_p2), %v2260_v9  ;;  %2096 = vset.pattern.permute.xlu0 (!%p1836_p2), %v2260_v9  ;;  %v2910_v59 = vld [vmem:[%s2395_s26 + $0x20] sm:$0xff] (!%p1836_p2)  ;;  %v1091_v9 = vld [vmem:[#allocation2 + $0x50] sm:$0xff] (!%p1836_p2) }
 0x20e   : > { %969 = vst.msk [vmem:[#allocation2 + $0x20] sm:$0xff] %vm964_vm15, %v952_v3  ;;  %v955_v27 = vadd.f32 %v931_v11, %v859_v15  ;;  %v1298_v15 = vunpack.c.h.bf16 (!%p1836_p2), %v2458_v6  ;;  %v1895_v3 = vld [vmem:[%s2409_s24 + $0x28] sm:$0xff] (!%p1836_p2)   ;;  %v1114_v11 = vadd.f32 (!%p1836_p2), 1e-12, %v1838_v23  ;;  %1383 = vadd.xlane.f32.xlu1 (!%p1836_p2), %v1360_v1  ;;  %v1244_v23 = vadd.f32 (!%p1836_p2), 1e-12, %v2906_v28 }
 0x20f   : > { %v941_v37 = vpop.xlane.xlu1 %940  ;;  %v1113_v1 = vadd.f32 (!%p1836_p2), 1e-12, %v1837_v18 }
 0x210   : > { %972 = vst.msk [vmem:[#allocation2 + $0x38] sm:$0xff] %vm964_vm15, %v955_v27  ;;  %v960_v61 = vadd.f32 %v941_v37, %v864_v54  ;;  %v1084_v54 = vld [vmem:[#allocation2 + $0x18] sm:$0xff] (!%p1836_p2)  ;;  %v1299_v27 = vunpack.c.l.bf16 (!%p1836_p2), %v2487_v29  ;;  %v1361_v37 = vmul.f32 (!%p1836_p2), %v1877_v62, %v1297_v30  ;;  %2098 = vlog2.f32 (!%p1836_p2), %v1114_v11  ;;  %v2913_v30 = vld [vmem:[%s2395_s26 + $0x28] sm:$0xff] (!%p1836_p2) }
 0x211   : > { %v947_v35 = vpop.xlane.xlu0 %946  ;;  %v1092_v11 = vld [vmem:[#allocation2 + $0x58] sm:$0xff] (!%p1836_p2) }
 0x212   : > { %977 = vst.msk [vmem:[#allocation2 + $0x60] sm:$0xff] %vm964_vm15, %v960_v61  ;;  %v963_v16 = vadd.f32 %v947_v35, %v867_v14  ;;  %v1881_v14 = vunpack.c.l.bf16 (!%p1836_p2), %v1895_v3  ;;  %v1115_v61 = vadd.f32 (!%p1836_p2), 1e-12, %v1839_v20  ;;  %v1840_v35 = vadd.f32 (!%p1836_p2), -3.4993e-05, %v1084_v54  ;;  %1385 = vadd.xlane.f32.xlu0 (!%p1836_p2), %v1361_v37  ;;  %v1194_v54 = vld [vmem:[#allocation3 + $0x8] sm:$0xff] (!%p1836_p2) }
 0x213   : > { %v1042_v60 = vpop.xlane.xlu1 %1041  ;;  %v1090_v48 = vld [vmem:[#allocation2 + $0x48] sm:$0xff] (!%p1836_p2)  ;;  %v1845_v20 = vadd.f32 (!%p1836_p2), -3.4993e-05, %v1089_v53  ;;  %v1245_v37 = vadd.f32 (!%p1836_p2), 1e-12, %v2910_v59 }
 0x214   : > { %980 = vst.msk [vmem:[#allocation2 + $0x78] sm:$0xff] %vm964_vm15, %v963_v16  ;;  %v1059_v7 = vadd.f32 %v1042_v60, %v995_v57  ;;  %v1362_v57 = vmul.f32 (!%p1836_p2), %v1878_v32, %v1298_v15  ;;  %v1300_v16 = vunpack.c.h.bf16 (!%p1836_p2), %v2487_v29  ;;  %v1882_v60 = vunpack.c.h.bf16 (!%p1836_p2), %v1895_v3 }
 0x215   : > { %v927_v36 = vpop.xlane.xlu0 %926  ;;  %v1085_v6 = vld [vmem:[#allocation2 + $0x20] sm:$0xff] (!%p1836_p2)  ;;  %2100 = vlog2.f32 (!%p1836_p2), %v1115_v61  ;;  %v1846_v15 = vadd.f32 (!%p1836_p2), -3.4993e-05, %v1090_v48 }
 0x216   : > { %1075 = vst.msk [vmem:[#allocation3 + $0x70] sm:$0xff] %vm964_vm15, %v1059_v7  ;;  %v953_v52 = vadd.f32 %v927_v36, %v857_v41  ;;  %v1896_v41 = vld [vmem:[%s2409_s24 + $0x30] sm:$0xff] (!%p1836_p2)   ;;  %v1301_v7 = vunpack.c.l.bf16 (!%p1836_p2), %v2493_v31  ;;  %v1363_v36 = vmul.f32 (!%p1836_p2), %v1881_v14, %v1299_v27  ;;  %1387 = vadd.xlane.f32.xlu1 (!%p1836_p2), %v1362_v57  ;;  %v1847_v57 = vadd.f32 (!%p1836_p2), -3.4993e-05, %v1091_v9 }
 0x217   : > { %v1088_v38 = vld [vmem:[#allocation2 + $0x38] sm:$0xff] (!%p1836_p2) }
 0x218   : > { %970 = vst.msk [vmem:[#allocation2 + $0x28] sm:$0xff] %vm964_vm15, %v953_v52  ;;  %v1885_v52 = vunpack.c.l.bf16 (!%p1836_p2), %v1896_v41  ;;  %1389 = vadd.xlane.f32.xlu0 (!%p1836_p2), %v1363_v36  ;;  %v1844_v49 = vadd.f32 (!%p1836_p2), -3.4993e-05, %v1088_v38 }
 0x219   : > { %v943_v22 = vpop.xlane.xlu0 %942 }
 0x21a   : > { %v961_v12 = vadd.f32 %v943_v22, %v865_v17  ;;  %1080 = sbr.rel (%p1836_p2) target bundleno = 826 (0x33a), region = 56  ;;  %v1116_v17 = vadd.f32 (!%p1836_p2), 1e-12, %v1840_v35  ;;  %v1364_v22 = vmul.f32 (!%p1836_p2), %v1882_v60, %v1300_v16  ;;  %v1365_v58 = vmul.f32 (!%p1836_p2), %v1885_v52, %v1301_v7  ;;  %v2099_v2 = vpop.eup (!%p1836_p2), %2098  ;;  %v1093_v16 = vld [vmem:[#allocation2 + $0x60] sm:$0xff] (!%p1836_p2) }
 0x21b   : > { %v1132_v43 = vmul.f32 (!%p1836_p2), 0.6931472, %v2099_v2  ;;  %v1120_v62 = vadd.f32 (!%p1836_p2), 1e-12, %v1844_v49  ;;  %v1246_v35 = vadd.f32 (!%p1836_p2), 1e-12, %v2913_v30 }
 0x21c   : > { %978 = vst.msk [vmem:[#allocation2 + $0x68] sm:$0xff] %vm964_vm15, %v961_v12  ;;  %v1302_v12 = vunpack.c.h.bf16 (!%p1836_p2), %v2493_v31  ;;  %2102 = vlog2.f32 (!%p1836_p2), %v1116_v17  ;;  %1391 = vadd.xlane.f32.xlu1 (!%p1836_p2), %v1364_v22  ;;  %v1087_v31 = vld [vmem:[#allocation2 + $0x30] sm:$0xff] (!%p1836_p2)  ;;  %1393 = vadd.xlane.f32.xlu0 (!%p1836_p2), %v1365_v58  ;;  %v2918_v60 = vld [vmem:[%s2395_s26] sm:$0xff] (!%p1836_p2)  ;;  %v1848_v7 = vadd.f32 (!%p1836_p2), -3.4993e-05, %v1092_v11  ;;  %v2921_v17 = vld [vmem:[%s2395_s26 + $0x48] sm:$0xff] (!%p1836_p2) }
 0x21d   : > { %v1044_v24 = vpop.xlane.xlu0 %1043  ;;  %v1843_v0 = vadd.f32 (!%p1836_p2), -3.4993e-05, %v1087_v31  ;;  %v1162_v55 = vadd.f32 (!%p1836_p2), 14.285714, %v1132_v43  ;;  %v1095_v2 = vld [vmem:[#allocation2 + $0x70] sm:$0xff] (!%p1836_p2)  ;;  %v2934_v43 = vld [vmem:[%s2395_s26 + $0x38] sm:$0xff] (!%p1836_p2) }
 0x21e   : > { %v1060_v25 = vadd.f32 %v1044_v24, %v996_v45  ;;  %v1886_v45 = vunpack.c.h.bf16 (!%p1836_p2), %v1896_v41  ;;  %v1897_v24 = vld [vmem:[%s2409_s24 + $0x38] sm:$0xff] (!%p1836_p2)   ;;  %v1121_v41 = vadd.f32 (!%p1836_p2), 1e-12, %v1845_v20  ;;  %v1197_v20 = vld [vmem:[#allocation3 + $0x20] sm:$0xff] (!%p1836_p2) }
 0x21f   : > { %v1086_v29 = vld [vmem:[#allocation2 + $0x28] sm:$0xff] (!%p1836_p2)  ;;  %v1889_v4 = vunpack.c.l.bf16 (!%p1836_p2), %v1897_v24  ;;  %v1890_v42 = vunpack.c.h.bf16 (!%p1836_p2), %v1897_v24  ;;  %v2101_v5 = vpop.eup (!%p1836_p2), %2100  ;;  %v1119_v50 = vadd.f32 (!%p1836_p2), 1e-12, %v1843_v0  ;;  %v1210_v27 = vmul.f32 (!%p1836_p2), %v1178_v26, %v1162_v55  ;;  %v2930_v0 = vld [vmem:[%s2395_s26 + $0x58] sm:$0xff] (!%p1836_p2) }
 0x220   : > { %1076 = vst.msk [vmem:[#allocation3 + $0x78] sm:$0xff] %vm964_vm15, %v1060_v25  ;;  %v1841_v25 = vadd.f32 (!%p1836_p2), -3.4993e-05, %v1085_v6  ;;  %v1366_v46 = vmul.f32 (!%p1836_p2), %v1886_v45, %v1302_v12  ;;  %v1842_v21 = vadd.f32 (!%p1836_p2), -3.4993e-05, %v1086_v29  ;;  %v1096_v12 = vld [vmem:[#allocation2 + $0x78] sm:$0xff] (!%p1836_p2) }
 0x221   : > { %v1367_v10 = vmul.f32 %v1889_v4, %v1303_v56  ;;  %v1368_v63 = vmul.f32 %v1890_v42, %v1304_v8  ;;  %v1134_v47 = vmul.f32 0.6931472, %v2101_v5  ;;  %v1122_v6 = vadd.f32 1e-12, %v1846_v15  ;;  %v2925_v4 = vld [vmem:[%s2395_s26 + $0x30] sm:$0xff] }
 0x222   : > { %v1117_v34 = vadd.f32 1e-12, %v1841_v25  ;;  %1395 = vadd.xlane.f32.xlu1 %v1366_v46  ;;  %v1118_v33 = vadd.f32 1e-12, %v1842_v21  ;;  %v1226_v24 = vsub.f32 %v1194_v54, %v1210_v27  ;;  %v1195_v25 = vld [vmem:[#allocation3 + $0x10] sm:$0xff] }
 0x223   : > { %1397 = vadd.xlane.f32.xlu0 %v1367_v10  ;;  %v1163_v32 = vadd.f32 14.285714, %v1134_v47  ;;  %v1094_v14 = vld [vmem:[#allocation2 + $0x68] sm:$0xff]  ;;  %v1241_v56 = vadd.f32 1e-12, %v2918_v60 }
 0x224   : > { %2104 = vlog2.f32 %v1117_v34  ;;  %v1850_v22 = vadd.f32 -3.4993e-05, %v1094_v14  ;;  %v1123_v8 = vadd.f32 1e-12, %v1847_v57  ;;  %v1849_v46 = vadd.f32 -3.4993e-05, %v1093_v16 }
 0x225   : > { %2106 = vrcp.f32 %v1242_v40  ;;  %v1211_v36 = vmul.f32 %v1179_v51, %v1163_v32  ;;  %v1250_v42 = vadd.f32 1e-12, %v2921_v17  ;;  %v1124_v26 = vadd.f32 1e-12, %v1848_v7 }
 0x226   : > { %1399 = vadd.xlane.f32.xlu1 %v1368_v63  ;;  %2108 = vlog2.f32 %v1118_v33  ;;  %v2103_v13 = vpop.eup %2102  ;;  %v1852_v34 = vadd.f32 -3.4993e-05, %v1096_v12  ;;  %v1126_v10 = vadd.f32 1e-12, %v1850_v22  ;;  %v1196_v63 = vld [vmem:[#allocation3 + $0x18] sm:$0xff] }
 0x227   : > { %2110 = vrcp.f32 %v1243_v19  ;;  %v1136_v3 = vmul.f32 0.6931472, %v2103_v13  ;;  %v1227_v21 = vsub.f32 %v1195_v25, %v1211_v36  ;;  %v1247_v5 = vadd.f32 1e-12, %v2925_v4  ;;  %v2938_v13 = vld [vmem:[%s2395_s26 + $0x68] sm:$0xff] }
 0x228   : > { %2112 = vlog2.f32 %v1119_v50  ;;  %v1851_v19 = vadd.f32 -3.4993e-05, %v1095_v2  ;;  %v1128_v18 = vadd.f32 1e-12, %v1852_v34  ;;  %v1252_v48 = vadd.f32 1e-12, %v2930_v0 }
 0x229   : > { %2114 = vrcp.f32 %v1244_v23  ;;  %v1164_v52 = vadd.f32 14.285714, %v1136_v3  ;;  %v2943_v3 = vld [vmem:[%s2395_s26 + $0x40] sm:$0xff]  ;;  %v1254_v54 = vadd.f32 1e-12, %v2938_v13  ;;  %v1198_v36 = vld [vmem:[#allocation3 + $0x28] sm:$0xff] }
 0x22a   : > { %2116 = vlog2.f32 %v1120_v62  ;;  %v1127_v11 = vadd.f32 1e-12, %v1851_v19  ;;  %v1202_v34 = vld [vmem:[#allocation3 + $0x48] sm:$0xff] }
 0x22b   : > { %2118 = vlog2.f32 %v1113_v1  ;;  %v1212_v31 = vmul.f32 %v2906_v28, %v1164_v52  ;;  %v1125_v28 = vadd.f32 1e-12, %v1849_v46  ;;  %v1248_v1 = vadd.f32 1e-12, %v2934_v43 }
 0x22c   : > { %2120 = vrcp.f32 %v1245_v37  ;;  %v1249_v52 = vadd.f32 1e-12, %v2943_v3 }
 0x22d   : > { %2122 = vrcp.f32 %v1246_v35  ;;  %v1228_v53 = vsub.f32 %v1196_v63, %v1212_v31  ;;  %v1199_v31 = vld [vmem:[#allocation3 + $0x30] sm:$0xff] }
 0x22e   : > { %v2105_v61 = vpop.eup %2104  ;;  %2124 = vlog2.f32 %v1122_v6  ;;  %v1193_v6 = vld [vmem:[#allocation3] sm:$0xff] }
 0x22f   : > { %v2107_v45 = vpop.eup %2106  ;;  %v1138_v29 = vmul.f32 0.6931472, %v2105_v61  ;;  %2126 = vlog2.f32 %v1121_v41  ;;  %v2947_v61 = vld [vmem:[%s2395_s26 + $0x78] sm:$0xff] }
 0x230   : > { %v2109_v58 = vpop.eup %2108  ;;  %v1260_v38 = vmul.f32 %v2107_v45, %v1226_v24  ;;  %2128 = vrcp.f32 %v1241_v56  ;;  %v1256_v24 = vadd.f32 1e-12, %v2947_v61  ;;  %v2954_v56 = vld [vmem:[%s2395_s26 + $0x50] sm:$0xff] }
 0x231   : > { %v2111_v40 = vpop.eup %2110  ;;  %v1165_v51 = vadd.f32 14.285714, %v1138_v29  ;;  %v1140_v33 = vmul.f32 0.6931472, %v2109_v58  ;;  %2130 = vlog2.f32 %v1123_v8  ;;  %v1251_v63 = vadd.f32 1e-12, %v2954_v56 }
 0x232   : > { %v2113_v39 = vpop.eup %2112  ;;  %2132 = vlog2.f32 %v1124_v26  ;;  %v1262_v50 = vmul.f32 %v2111_v40, %v1227_v21 }
 0x233   : > { %v2115_v49 = vpop.eup %2114  ;;  %2134 = vrcp.f32 %v1250_v42  ;;  %v1213_v23 = vmul.f32 %v2910_v59, %v1165_v51  ;;  %v1166_v62 = vadd.f32 14.285714, %v1140_v33  ;;  %v1142_v9 = vmul.f32 0.6931472, %v2113_v39  ;;  %v1189_v39 = vld [vmem:[%s2395_s26 + $0x60] sm:$0xff] }
 0x234   : > { %v2117_v47 = vpop.eup %2116  ;;  %2136 = vlog2.f32 %v1126_v10  ;;  %v1264_v37 = vmul.f32 %v2115_v49, %v1228_v53  ;;  %v1204_v53 = vld [vmem:[#allocation3 + $0x58] sm:$0xff] }
 0x235   : > { %v2119_v55 = vpop.eup %2118  ;;  %2138 = vrcp.f32 %v1247_v5  ;;  %v1144_v14 = vmul.f32 0.6931472, %v2117_v47  ;;  %v1229_v57 = vsub.f32 %v1197_v20, %v1213_v23  ;;  %v1214_v16 = vmul.f32 %v2913_v30, %v1166_v62  ;;  %v1200_v47 = vld [vmem:[#allocation3 + $0x38] sm:$0xff] }
 0x236   : > { %v1130_v15 = vmul.f32 0.6931472, %v2119_v55  ;;  %v2121_v32 = vpop.eup %2120  ;;  %2140 = vlog2.f32 %v1128_v18  ;;  %v1167_v41 = vadd.f32 14.285714, %v1142_v9  ;;  %v1253_v20 = vadd.f32 1e-12, %v1189_v39 }
 0x237   : > { %1441 = vperm.xlu1 %2097, %v1260_v38   ;;  %v2123_v27 = vpop.eup %2122  ;;  %2142 = vlog2.f32 %v1125_v28  ;;  %v1168_v29 = vadd.f32 14.285714, %v1144_v14  ;;  %v1266_v46 = vmul.f32 %v2121_v32, %v1229_v57  ;;  %v1230_v42 = vsub.f32 %v1198_v36, %v1214_v16  ;;  %v1208_v16 = vld [vmem:[#allocation3 + $0x78] sm:$0xff] }
 0x238   : > { %v1161_v59 = vadd.f32 14.285714, %v1130_v15  ;;  %v2125_v35 = vpop.eup %2124  ;;  %2144 = vrcp.f32 %v1252_v48  ;;  %v1215_v26 = vmul.f32 %v2925_v4, %v1167_v41 }
 0x239   : > { %v2127_v7 = vpop.eup %2126  ;;  %2146 = vrcp.f32 %v1248_v1  ;;  %v1148_v12 = vmul.f32 0.6931472, %v2125_v35  ;;  %v1216_v33 = vmul.f32 %v2934_v43, %v1168_v29  ;;  %v1268_v19 = vmul.f32 %v2123_v27, %v1230_v42  ;;  %v1206_v1 = vld [vmem:[#allocation3 + $0x68] sm:$0xff] }
 0x23a   : > { %v1209_v22 = vmul.f32 %v2918_v60, %v1161_v59  ;;  %v2129_v45 = vpop.eup %2128  ;;  %2148 = vrcp.f32 %v1254_v54  ;;  %v1146_v60 = vmul.f32 0.6931472, %v2127_v7  ;;  %v1231_v18 = vsub.f32 %v1199_v31, %v1215_v26 }
 0x23b   : > { %1446 = vperm.xlu1 %2097, %v1262_v50   ;;  %v2131_v25 = vpop.eup %2130  ;;  %2150 = vlog2.f32 %v1127_v11  ;;  %v1170_v58 = vadd.f32 14.285714, %v1148_v12  ;;  %v1232_v32 = vsub.f32 %v1200_v47, %v1216_v33  ;;  %v1191_v11 = vld [vmem:[%s2395_s26 + $0x70] sm:$0xff]  ;;  %v1338_v47 = vld [vmem:[%s2414_s29 + $0x8] sm:$0xff] }
 0x23c   : > { %v1225_v30 = vsub.f32 %v1193_v6, %v1209_v22  ;;  %v2133_v8 = vpop.eup %2132  ;;  %2152 = vrcp.f32 %v1249_v52  ;;  %v1150_v50 = vmul.f32 0.6931472, %v2131_v25  ;;  %v1201_v6 = vld [vmem:[#allocation3 + $0x40] sm:$0xff]  ;;  %v1255_v22 = vadd.f32 1e-12, %v1191_v11 }
 0x23d   : > { %v2135_v21 = vpop.eup %2134  ;;  %v1218_v10 = vmul.f32 %v2921_v17, %v1170_v58  ;;  %v1152_v40 = vmul.f32 0.6931472, %v2133_v8  ;;  %2154 = vrcp.f32 %v1256_v24  ;;  %v1169_v17 = vadd.f32 14.285714, %v1146_v60  ;;  %v1203_v8 = vld [vmem:[#allocation3 + $0x50] sm:$0xff] }
 0x23e   : > { %v1258_v2 = vmul.f32 %v2129_v45, %v1225_v30  ;;  %v2137_v38 = vpop.eup %2136  ;;  %2156 = vrcp.f32 %v1251_v63 }
 0x23f   : > { %1451 = vperm.xlu1 %2097, %v1264_v37   ;;  %v2139_v51 = vpop.eup %2138  ;;  %v1234_v5 = vsub.f32 %v1202_v34, %v1218_v10  ;;  %v1172_v4 = vadd.f32 14.285714, %v1152_v40  ;;  %v1156_v49 = vmul.f32 0.6931472, %v2137_v38  ;;  %v1217_v35 = vmul.f32 %v2943_v3, %v1169_v17  ;;  %v1207_v40 = vld [vmem:[#allocation3 + $0x70] sm:$0xff] }
 0x240   : > { %1436 = vperm.xlu0 %2096, %v1258_v2   ;;  %v2141_v28 = vpop.eup %2140  ;;  %v1270_v59 = vmul.f32 %v2139_v51, %v1231_v18  ;;  %2158 = vrcp.f32 %v1253_v20 }
 0x241   : > { %v2143_v48 = vpop.eup %2142  ;;  %v1276_v55 = vmul.f32 %v2135_v21, %v1234_v5  ;;  %v1220_v23 = vmul.f32 %v2930_v0, %v1172_v4  ;;  %v1174_v62 = vadd.f32 14.285714, %v1156_v49  ;;  %v1160_v43 = vmul.f32 0.6931472, %v2141_v28  ;;  %v1205_v21 = vld [vmem:[#allocation3 + $0x60] sm:$0xff] }
 0x242   : > { %v2145_v9 = vpop.eup %2144  ;;  %v1171_v0 = vadd.f32 14.285714, %v1150_v50  ;;  %v1154_v57 = vmul.f32 0.6931472, %v2143_v48  ;;  %v1233_v29 = vsub.f32 %v1201_v6, %v1217_v35  ;;  %2160 = vrcp.f32 %v1255_v22 }
 0x243   : > { %1456 = vperm.xlu1 %2097, %v1266_v46   ;;  %v2147_v15 = vpop.eup %2146  ;;  %v1236_v54 = vsub.f32 %v1204_v53, %v1220_v23  ;;  %v1222_v27 = vmul.f32 %v2938_v13, %v1174_v62  ;;  %v1176_v37 = vadd.f32 14.285714, %v1160_v43  ;;  %v1340_v23 = vld [vmem:[%s2414_s29 + $0x18] sm:$0xff]  ;;  %v1341_v43 = vld [vmem:[%s2414_s29 + $0x20] sm:$0xff] }
 0x244   : > { %1481 = vperm.xlu0 %2096, %v1276_v55   ;;  %v2149_v14 = vpop.eup %2148  ;;  %v1272_v45 = vmul.f32 %v2147_v15, %v1232_v32  ;;  %v1219_v3 = vmul.f32 %v2954_v56, %v1171_v0  ;;  %v1173_v30 = vadd.f32 14.285714, %v1154_v57  ;;  %v1344_v57 = vld [vmem:[%s2414_s29 + $0x38] sm:$0xff] }
 0x245   : > { %v2151_v41 = vpop.eup %2150  ;;  %v1280_v7 = vmul.f32 %v2145_v9, %v1236_v54  ;;  %v1238_v36 = vsub.f32 %v1206_v1, %v1222_v27  ;;  %v1224_v52 = vmul.f32 %v2947_v61, %v1176_v37  ;;  %v1343_v27 = vld [vmem:[%s2414_s29 + $0x30] sm:$0xff] }
 0x246   : > { %v2153_v12 = vpop.eup %2152  ;;  %v1158_v58 = vmul.f32 0.6931472, %v2151_v41  ;;  %v1235_v26 = vsub.f32 %v1203_v8, %v1219_v3  ;;  %v1221_v60 = vmul.f32 %v1189_v39, %v1173_v30  ;;  %v1337_v39 = vld [vmem:[%s2414_s29] sm:$0xff] }
 0x247   : > { %1461 = vperm.xlu1 %2097, %v1268_v19   ;;  %v1284_v13 = vmul.f32 %v2149_v14, %v1238_v36  ;;  %v1240_v24 = vsub.f32 %v1208_v16, %v1224_v52  ;;  %v2155_v25 = vpop.eup %2154  ;;  %v1274_v61 = vmul.f32 %v2153_v12, %v1233_v29  ;;  %v1339_v19 = vld [vmem:[%s2414_s29 + $0x10] sm:$0xff]  ;;  %v1345_v41 = vld [vmem:[%s2414_s29 + $0x40] sm:$0xff]  ;;  %v1346_v12 = vld [vmem:[%s2414_s29 + $0x48] sm:$0xff] }
 0x248   : > { %1491 = vperm.xlu0 %2096, %v1280_v7   ;;  %v2157_v42 = vpop.eup %2156  ;;  %v1175_v34 = vadd.f32 14.285714, %v1158_v58  ;;  %v1237_v2 = vsub.f32 %v1205_v21, %v1221_v60  ;;  %v1348_v58 = vld [vmem:[%s2414_s29 + $0x58] sm:$0xff]  ;;  %v1350_v21 = vld [vmem:[%s2414_s29 + $0x68] sm:$0xff] }
 0x249   : > { %v1288_v46 = vmul.f32 %v2155_v25, %v1240_v24  ;;  %v1278_v31 = vmul.f32 %v2157_v42, %v1235_v26 }
 0x24a   : > { %v1223_v56 = vmul.f32 %v1191_v11, %v1175_v34  ;;  %v2159_v10 = vpop.eup %2158  ;;  %v1342_v11 = vld [vmem:[%s2414_s29 + $0x28] sm:$0xff] }
 0x24b   : > { %1466 = vperm.xlu1 %2097, %v1270_v59   ;;  %v1282_v38 = vmul.f32 %v2159_v10, %v1237_v2  ;;  %v1351_v2 = vld [vmem:[%s2414_s29 + $0x70] sm:$0xff] }
 0x24c   : > { %1501 = vperm.xlu0 %2096, %v1284_v13   ;;  %v1239_v63 = vsub.f32 %v1207_v40, %v1223_v56  ;;  %v2161_v51 = vpop.eup %2160  ;;  %v1347_v13 = vld [vmem:[%s2414_s29 + $0x50] sm:$0xff] }
 0x24e   : > { %v1286_v33 = vmul.f32 %v2161_v51, %v1239_v63  ;;  %v1352_v51 = vld [vmem:[%s2414_s29 + $0x78] sm:$0xff] }
 0x24f   : > { %1471 = vperm.xlu1 %2097, %v1272_v45  }
 0x250   : > { %1511 = vperm.xlu0 %2096, %v1288_v46   ;;  %v1349_v46 = vld [vmem:[%s2414_s29 + $0x60] sm:$0xff] }
 0x253   : > { %1476 = vperm.xlu1 %2097, %v1274_v61  }
 0x257   : > { %1486 = vperm.xlu1 %2097, %v1278_v31  }
 0x25b   : > { %1496 = vperm.xlu1 %2097, %v1282_v38  }
 0x25f   : > { %1506 = vperm.xlu1 %2097, %v1286_v33  }
 0x28d   : > { %v1370_v5 = vpop.xlane.xlu0 %1369 }
 0x28e   : > { %v1401_v49 = vsub.f32 1.0, %v1370_v5 }
 0x28f   : > { %v1374_v4 = vpop.xlane.xlu1 %1373 }
 0x290   : > { %v1403_v28 = vsub.f32 1.0, %v1374_v4  ;;  %v1417_v18 = vmul.f32 %v1401_v49, %v1337_v39 }
 0x291   : > { %v1372_v17 = vpop.xlane.xlu0 %1371 }
 0x292   : > { %v1419_v53 = vmul.f32 %v1403_v28, %v1339_v19  ;;  %v1402_v48 = vsub.f32 1.0, %v1372_v17  ;;  %1516 = vperm.xlu1 %2097, %v1417_v18  }
 0x293   : > { %v1376_v50 = vpop.xlane.xlu1 %1375 }
 0x294   : > { %v1404_v55 = vsub.f32 1.0, %v1376_v50  ;;  %v1418_v62 = vmul.f32 %v1402_v48, %v1338_v47 }
 0x295   : > { %v1378_v9 = vpop.xlane.xlu0 %1377 }
 0x296   : > { %v1420_v1 = vmul.f32 %v1404_v55, %v1340_v23  ;;  %v1405_v15 = vsub.f32 1.0, %v1378_v9  ;;  %1526 = vperm.xlu1 %2097, %v1419_v53   ;;  %1521 = vperm.xlu0 %2096, %v1418_v62  }
 0x297   : > { %v1380_v20 = vpop.xlane.xlu1 %1379 }
 0x298   : > { %v1406_v32 = vsub.f32 1.0, %v1380_v20  ;;  %v1421_v54 = vmul.f32 %v1405_v15, %v1341_v43 }
 0x299   : > { %v1382_v37 = vpop.xlane.xlu0 %1381 }
 0x29a   : > { %v1422_v59 = vmul.f32 %v1406_v32, %v1342_v11  ;;  %v1407_v35 = vsub.f32 1.0, %v1382_v37  ;;  %1536 = vperm.xlu1 %2097, %v1421_v54   ;;  %1531 = vperm.xlu0 %2096, %v1420_v1  }
 0x29b   : > { %v1384_v14 = vpop.xlane.xlu1 %1383 }
 0x29c   : > { %v1408_v0 = vsub.f32 1.0, %v1384_v14  ;;  %v1423_v16 = vmul.f32 %v1407_v35, %v1343_v27 }
 0x29e   : > { %v1424_v36 = vmul.f32 %v1408_v0, %v1344_v57  ;;  %1546 = vperm.xlu1 %2097, %v1423_v16   ;;  %1541 = vperm.xlu0 %2096, %v1422_v59  }
 0x29f   : > { %v1386_v6 = vpop.xlane.xlu0 %1385 }
 0x2a0   : > { %v1409_v52 = vsub.f32 1.0, %v1386_v6 }
 0x2a2   : > { %v1425_v45 = vmul.f32 %v1409_v52, %v1345_v41  ;;  %1551 = vperm.xlu0 %2096, %v1424_v36  }
 0x2a3   : > { %v1388_v7 = vpop.xlane.xlu1 %1387 }
 0x2a4   : > { %v1410_v22 = vsub.f32 1.0, %v1388_v7  ;;  %1556 = vperm.xlu1 %2097, %v1425_v45  }
 0x2a5   : > { %v1390_v24 = vpop.xlane.xlu0 %1389 }
 0x2a6   : > { %v1426_v29 = vmul.f32 %v1410_v22, %v1346_v12  ;;  %v1411_v3 = vsub.f32 1.0, %v1390_v24 }
 0x2a8   : > { %v1427_v8 = vmul.f32 %v1411_v3, %v1347_v13  ;;  %1561 = vperm.xlu0 %2096, %v1426_v29  }
 0x2a9   : > { %v1392_v25 = vpop.xlane.xlu1 %1391  ;;  %v1394_v42 = vpop.xlane.xlu0 %1393 }
 0x2aa   : > { %v1412_v30 = vsub.f32 1.0, %v1392_v25  ;;  %v1413_v60 = vsub.f32 1.0, %v1394_v42  ;;  %1566 = vperm.xlu1 %2097, %v1427_v8  }
 0x2ac   : > { %v1428_v26 = vmul.f32 %v1412_v30, %v1348_v58  ;;  %v1429_v31 = vmul.f32 %v1413_v60, %v1349_v46 }
 0x2ae   : > { %1576 = vperm.xlu1 %2097, %v1429_v31   ;;  %1571 = vperm.xlu0 %2096, %v1428_v26  }
 0x2af   : > { %v1396_v61 = vpop.xlane.xlu1 %1395 }
 0x2b0   : > { %v1414_v34 = vsub.f32 1.0, %v1396_v61  ;;  %v1398_v56 = vpop.xlane.xlu0 %1397 }
 0x2b1   : > { %v1415_v38 = vsub.f32 1.0, %v1398_v56 }
 0x2b2   : > { %v1430_v40 = vmul.f32 %v1414_v34, %v1350_v21 }
 0x2b3   : > { %v1400_v10 = vpop.xlane.xlu1 %1399  ;;  %v1431_v33 = vmul.f32 %v1415_v38, %v1351_v2 }
 0x2b4   : > { %v1416_v63 = vsub.f32 1.0, %v1400_v10  ;;  %1581 = vperm.xlu0 %2096, %v1430_v40  }
 0x2b5   : > { %1586 = vperm.xlu1 %2097, %v1431_v33  }
 0x2b6   : > { %v1432_v39 = vmul.f32 %v1416_v63, %v1352_v51 }
 0x2b7   : > { %v1442_v5 = vpop.permute.xlu1 %1441 }
 0x2b8   : > { %1591 = vperm.xlu0 %2096, %v1432_v39  }
 0x2bb   : > { %v1447_v4 = vpop.permute.xlu1 %1446 }
 0x2bf   : > { %v1452_v49 = vpop.permute.xlu1 %1451  ;;  %v1437_v17 = vpop.permute.xlu0 %1436 }
 0x2c3   : > { %v1457_v28 = vpop.permute.xlu1 %1456  ;;  %v1482_v53 = vpop.permute.xlu0 %1481 }
 0x2c7   : > { %v1462_v19 = vpop.permute.xlu1 %1461  ;;  %v1492_v55 = vpop.permute.xlu0 %1491 }
 0x2cb   : > { %v1467_v18 = vpop.permute.xlu1 %1466  ;;  %v1502_v62 = vpop.permute.xlu0 %1501 }
 0x2cf   : > { %v1472_v47 = vpop.permute.xlu1 %1471  ;;  %v1512_v9 = vpop.permute.xlu0 %1511 }
 0x2d3   : > { %v1477_v50 = vpop.permute.xlu1 %1476 }
 0x2d7   : > { %v1487_v48 = vpop.permute.xlu1 %1486 }
 0x2db   : > { %v1497_v23 = vpop.permute.xlu1 %1496 }
 0x2df   : > { %v1507_v43 = vpop.permute.xlu1 %1506 }
 0x311   : > { %v1517_v20 = vpop.permute.xlu1 %1516 }
 0x312   : > { %v1594_v1 = vsel %vm1433_vm4, %v1437_v17, %v1517_v20 }
 0x313   : > { %1610 = vst [vmem:[%s2416_s17] sm:$0xff] %v1594_v1 }
 0x315   : > { %v1527_v15 = vpop.permute.xlu1 %1526  ;;  %v1522_v32 = vpop.permute.xlu0 %1521 }
 0x316   : > { %v1596_v11 = vsel %vm1433_vm4, %v1447_v4, %v1527_v15  ;;  %v1595_v54 = vsel %vm1433_vm4, %v1442_v5, %v1522_v32 }
 0x317   : > { %1612 = vst [vmem:[%s2416_s17 + $0x10] sm:$0xff] %v1596_v11  ;;  %1611 = vst [vmem:[%s2416_s17 + $0x8] sm:$0xff] %v1595_v54 }
 0x319   : > { %v1537_v27 = vpop.permute.xlu1 %1536  ;;  %v1532_v37 = vpop.permute.xlu0 %1531 }
 0x31a   : > { %v1598_v14 = vsel %vm1433_vm4, %v1457_v28, %v1537_v27  ;;  %v1597_v59 = vsel %vm1433_vm4, %v1452_v49, %v1532_v37 }
 0x31b   : > { %1614 = vst [vmem:[%s2416_s17 + $0x20] sm:$0xff] %v1598_v14  ;;  %1613 = vst [vmem:[%s2416_s17 + $0x18] sm:$0xff] %v1597_v59 }
 0x31d   : > { %v1547_v35 = vpop.permute.xlu1 %1546  ;;  %v1542_v0 = vpop.permute.xlu0 %1541 }
 0x31e   : > { %v1600_v57 = vsel %vm1433_vm4, %v1467_v18, %v1547_v35  ;;  %v1599_v16 = vsel %vm1433_vm4, %v1462_v19, %v1542_v0 }
 0x31f   : > { %1616 = vst [vmem:[%s2416_s17 + $0x30] sm:$0xff] %v1600_v57  ;;  %1615 = vst [vmem:[%s2416_s17 + $0x28] sm:$0xff] %v1599_v16 }
 0x321   : > { %v1552_v6 = vpop.permute.xlu0 %1551 }
 0x322   : > { %v1601_v36 = vsel %vm1433_vm4, %v1472_v47, %v1552_v6 }
 0x323   : > { %v1557_v41 = vpop.permute.xlu1 %1556  ;;  %1617 = vst [vmem:[%s2416_s17 + $0x38] sm:$0xff] %v1601_v36 }
 0x324   : > { %v1602_v7 = vsel %vm1433_vm4, %v1477_v50, %v1557_v41 }
 0x325   : > { %1618 = vst [vmem:[%s2416_s17 + $0x40] sm:$0xff] %v1602_v7 }
 0x327   : > { %v1562_v22 = vpop.permute.xlu0 %1561 }
 0x328   : > { %v1603_v45 = vsel %vm1433_vm4, %v1482_v53, %v1562_v22 }
 0x329   : > { %v1567_v52 = vpop.permute.xlu1 %1566  ;;  %1619 = vst [vmem:[%s2416_s17 + $0x48] sm:$0xff] %v1603_v45 }
 0x32a   : > { %v1604_v12 = vsel %vm1433_vm4, %v1487_v48, %v1567_v52 }
 0x32b   : > { %1620 = vst [vmem:[%s2416_s17 + $0x50] sm:$0xff] %v1604_v12 }
 0x32d   : > { %v1577_v13 = vpop.permute.xlu1 %1576  ;;  %v1572_v24 = vpop.permute.xlu0 %1571 }
 0x32e   : > { %v1606_v25 = vsel %vm1433_vm4, %v1497_v23, %v1577_v13  ;;  %v1605_v29 = vsel %vm1433_vm4, %v1492_v55, %v1572_v24 }
 0x32f   : > { %1622 = vst [vmem:[%s2416_s17 + $0x60] sm:$0xff] %v1606_v25  ;;  %1621 = vst [vmem:[%s2416_s17 + $0x58] sm:$0xff] %v1605_v29 }
 0x333   : > { %v1582_v30 = vpop.permute.xlu0 %1581 }
 0x334   : > { %v1587_v3 = vpop.permute.xlu1 %1586  ;;  %v1607_v8 = vsel %vm1433_vm4, %v1502_v62, %v1582_v30 }
 0x335   : > { %v1608_v58 = vsel %vm1433_vm4, %v1507_v43, %v1587_v3  ;;  %1623 = vst [vmem:[%s2416_s17 + $0x68] sm:$0xff] %v1607_v8 }
 0x336   : > { %1624 = vst [vmem:[%s2416_s17 + $0x70] sm:$0xff] %v1608_v58 }
 0x337   : > { %v1592_v46 = vpop.permute.xlu0 %1591 }
 0x338   : > { %v1609_v42 = vsel %vm1433_vm4, %v1512_v9, %v1592_v46 }
 0x339   : > { %1625 = vst [vmem:[%s2416_s17 + $0x78] sm:$0xff] %v1609_v42 }
 0x33a PF: > { %s1858_s24 = sshll.u32 %s2244_s28, 11  ;;  %s1640_s14 = sshll.u32 %s2416_s17, 4  ;;  %s3039_s14 = int_to_ptr.vmem [resolvable:$true] %s1640_s14 }
 0x33b   : > { %s3036_s30 = scalar_lea.hbm %s3102_s7, %s1858_s24  ;;  %s3129_s18 = sand.u32 1, %s2232_s25  }
 0x33c   : > { %s3043_s20 = scalar_lea.sflag [#allocation6], %s3129_s18  ;;  %s2162_s22 = scalar_lea.vmem %s3039_s14, 2048 }
 0x33d   : > { %p2163_p4 = scmp.ne.s32.totalorder %s3039_s14, %s2162_s22  ;;  %s2261_s28 = smov [#allocation5]  }
 0x33e   : > { %s2166_s23 = sshll.u32 %s2261_s28, 4  ;;  %s2167_s23 = int_to_ptr.vmem [resolvable:$false] %s2166_s23 }
 0x33f   : > { %p2164_p5 = pnand %p2163_p4, %p2353_p3  ;;  %s2168_s15 = scalar_lea.vmem %s2167_s23, 4096 }
 0x340   : > { %p2169_p7 = scmp.lt.s32.totalorder %s3039_s14, %s2167_s23  ;;  %p2170_p8 = scmp.lt.s32.totalorder %s2168_s15, %s2162_s22 }
 0x341   : > { %p2165_p6 = pneg %p2164_p5 }
 0x342   : > { %p2171_p10 = por %p2170_p8, %p2169_p7 }
 0x344   : > { %p2172_p11 = pnand %p2171_p10, %p2165_p6 }
 0x346   : > { %2175 = shalt.err (!%p2172_p11)
}
 0x347   : > { %s2176_s19 = scalar_lea.hbm %s3036_s30, 2048  ;;  %s2180_s12 = scalar_lea.hbm %s3102_s7, 4096 }
 0x348   : > { %p2177_p12 = scmp.ne.s32.totalorder %s3036_s30, %s2176_s19  ;;  %p2181_p1 = scmp.lt.u32.totalorder %s3036_s30, %s3102_s7 }
 0x349   : > { %p2182_p2 = scmp.lt.u32.totalorder %s2180_s12, %s2176_s19  ;;  %p2184_p5 = scmp.lt.u32.totalorder %s2176_s19, %s3036_s30 }
 0x34a   : > { %p2178_p13 = pnand %p2177_p12, %p2353_p3 }
 0x34b   : > { %p2183_p4 = por %p2182_p2, %p2181_p1 }
 0x34c   : > { %p2179_p0 = pneg %p2178_p13 }
 0x34d   : > { %p2185_p6 = por %p2184_p5, %p2183_p4 }
 0x34f   : > { %p2186_p7 = pnand %p2185_p6, %p2179_p0 }
 0x351   : > { %2189 = shalt.err (!%p2186_p7)
}
 0x352   : > { %s2262_s29 = smov 128   ;;  %s2263_s17 = smov 8  }
 0x353   : > { %1962 = dma.vmem_to_hbm [thread:$0]  (%p2353_p3), %s3039_s14, 2048, %s3036_s30, %s3043_s20, %s2262_s29, %s2262_s29, %s2263_s17  }
 0x354 PF: > { %s3130_s0 = sld [smem:[#allocation12_spill]]  ;;  %s3131_s2 = sld [smem:[#allocation8_spill]] }
 0x35a   : > { %p1968_p8 = scmp.ge.s32.totalorder %s3130_s0, 2  ;;  %s1655_s11 = sand.u32 1, %s3131_s2  }
 0x35b   : > { %s1656_s24 = scalar_lea.sflag [#allocation6], %s1655_s11 }
 0x35c   : > { %p1965_p10 = pnand %p1968_p8, %p2363_p9 }
 0x35e   : > { %2223 = dma.done.wait (!%p1965_p10), %s1656_s24, 2048  }
 0x35f   : > { %2225 = vsyncadd (!%p1965_p10), %s1656_s24, 4294965248  ;;  %s20_s8 = sadd.s32 1, %s3130_s0   ;;  %s3133_s26 = sld [smem:[#allocation9_spill]] }
 0x360   : > { %p17_p11 = scmp.ge.s32.totalorder %s20_s8, 6   ;;  %s3134_s27 = sld [smem:[#allocation16_spill]] }
 0x361   : > { %s3135_s18 = sld [smem:[#allocation10_spill]]  ;;  %s3136_s28 = sld [smem:[#allocation11_spill]] }
 0x362   : > { %s3137_s29 = sld [smem:[#allocation13_spill]]  ;;  %s3138_s30 = sld [smem:[#allocation14_spill]] }
 0x363   : > { %s3139_s24 = smov %s2232_s25  ;;  %19 = sbr.rel (!%p17_p11) target bundleno = 8 (0x8), region = 109 }
 0x365   : > { %s3140_s25 = smov %s3133_s26 }
 0x366   : > { %s3141_s26 = smov %s3134_s27 }
 0x367   : > { %s3142_s27 = smov %s3135_s18 }
 0x36a   :  { %1661 = vsyncpa [#allocation6], 1 }
 0x36b   :  { %1663 = vsyncpa [#allocation6 + $0x1], 1 }

</bundles_post_ra>
